<compile_context>
chip_gen: v7x
topology: tpu7x:2x2x1
jax: 0.10.0
libtpu: 0.0.40
codegen_flags: <defaults>
</compile_context>

<pallas_src>
import math

import jax
import jax.numpy as jnp
import numpy as np
from jax.experimental import pallas as pl
from jax.experimental.pallas import tpu as pltpu


# ----------------------------------------------------------------------------
# Fused whole-model kernel (wavefront over layers x timesteps)
# ----------------------------------------------------------------------------
def make_model_kernel(num_layers, seq, bs, hidden):
    H = hidden
    L = num_layers

    def kernel(*refs):
        # refs = x_ref, (w4, u4, b4) * L, fc_w, fc_b, out_ref
        x_ref = refs[0]                           # (seq, bs, in) time-major
        layer_refs = refs[1:1 + 3 * L]
        fc_w_ref = refs[1 + 3 * L]                # (H, 128)  lane-padded head
        fc_b_ref = refs[2 + 3 * L]                # (1, 128)
        out_ref = refs[3 + 3 * L]                 # (bs, 128)

        # Hoist all weight loads out of the recurrence (loaded once as values).
        w4 = [layer_refs[3 * l][...] for l in range(L)]        # (in_l, 4H)
        u4 = [layer_refs[3 * l + 1][...] for l in range(L)]    # (H,    4H)
        b4 = [layer_refs[3 * l + 2][...] for l in range(L)]    # (1,    4H)

        h = [jnp.zeros((bs, H), jnp.float32) for _ in range(L)]
        c = [jnp.zeros((bs, H), jnp.float32) for _ in range(L)]
        # o_prev[l] = o_t emitted by layer l at the previous global step; it is
        # the input of layer l+1 this step (PyTorch module feeds o_t, not h_t,
        # to the next layer — faithfully reproduced).
        o_prev = [None] * L

        for s in range(seq + L - 1):              # wavefront: layer l does t=s-l
            o_snap = list(o_prev)                 # outputs from step s-1
            for l in range(L):
                t = s - l
                if t < 0 or t >= seq:
                    continue
                x_in = x_ref[t] if l == 0 else o_snap[l - 1]   # (bs, in_l)

                # Packed 4H-wide gate pre-activation: [i | f | g | o].
                gates = (jnp.dot(x_in, w4[l], preferred_element_type=jnp.float32)
                         + jnp.dot(h[l], u4[l], preferred_element_type=jnp.float32)
                         + b4[l])                                # (bs, 4H)

                # Whole-vreg activations: 2 EUP pushes per cell update.
                sig = jax.nn.sigmoid(gates)
                th = jnp.tanh(gates)

                i_t = sig[:, 0:H]
                f_t = sig[:, H:2 * H]
                g_t = th[:, 2 * H:3 * H]
                o_t = sig[:, 3 * H:4 * H]

                c[l] = f_t * c[l] + i_t * g_t
                h[l] = o_t * jnp.tanh(c[l])
                o_prev[l] = o_t

        # Lane-dense head: (bs, H) x (H, 128) matmul, single full-width store.
        out_ref[...] = (jnp.dot(h[L - 1], fc_w_ref[...],
                                preferred_element_type=jnp.float32)
                        + fc_b_ref[...])

    return kernel


# ----------------------------------------------------------------------------
# Wrapper
# ----------------------------------------------------------------------------
@jax.jit
def lstm_model_forward(x_bsi, params):
    """x_bsi: (batch, seq, input_sz) — same axis convention as the PyTorch module."""
    bs, seq, in_sz = x_bsi.shape
    H = params["fc_w"].shape[0]
    out_dim = params["fc_w"].shape[1]
    num_layers = len(params["layers"])

    # Time-major so the kernel reads x_ref[t] as a leading-axis index.
    x_tmaj = jnp.transpose(x_bsi, (1, 0, 2))      # (seq, bs, in)

    args = [x_tmaj]
    in_specs = [pl.BlockSpec(x_tmaj.shape, lambda: (0, 0, 0))]

    for (W, U, b) in params["layers"]:
        # Pack the 4 gates (order i, f, g(c), o) into one 4H-wide weight.
        w4 = jnp.concatenate([W[0], W[1], W[2], W[3]], axis=-1)   # (in_l, 4H)
        u4 = jnp.concatenate([U[0], U[1], U[2], U[3]], axis=-1)   # (H, 4H)
        b4 = jnp.concatenate([b[0], b[1], b[2], b[3]], axis=-1)   # (1, 4H)
        for a in (w4, u4, b4):
            args.append(a)
            in_specs.append(pl.BlockSpec(a.shape, lambda: (0, 0)))

    # Lane-dense FC head: zero-pad the output dim to 128 lanes.
    out_pad = max(128, ((out_dim + 127) // 128) * 128)
    fc_w = jnp.pad(params["fc_w"], ((0, 0), (0, out_pad - out_dim)))
    fc_b = jnp.pad(params["fc_b"], ((0, 0), (0, out_pad - out_dim)))
    args += [fc_w, fc_b]
    in_specs += [pl.BlockSpec(fc_w.shape, lambda: (0, 0)),
                 pl.BlockSpec(fc_b.shape, lambda: (0, 0))]

    kernel = make_model_kernel(num_layers, seq, bs, H)
    out_padded = pl.pallas_call(
        kernel,
        out_shape=jax.ShapeDtypeStruct((bs, out_pad), jnp.float32),
        in_specs=in_specs,
        out_specs=pl.BlockSpec((bs, out_pad), lambda: (0, 0)),
    )(*args)
    return out_padded[:, :out_dim]


# ----------------------------------------------------------------------------
# Deterministic parameter init (mirrors the PyTorch __init__ shapes)
# ----------------------------------------------------------------------------
def init_params(key, input_sz, hidden_sz, num_layers):
    layers = []
    stdv = 1.0 / math.sqrt(hidden_sz)
    for i in range(num_layers):
        in_sz = input_sz if i == 0 else hidden_sz
        key, kw, ku, kb = jax.random.split(key, 4)
        # index 0 -> i, 1 -> f, 2 -> c (g), 3 -> o  (matches the PyTorch params)
        W = jax.random.uniform(kw, (4, in_sz, hidden_sz), jnp.float32, -stdv, stdv)
        U = jax.random.uniform(ku, (4, hidden_sz, hidden_sz), jnp.float32, -stdv, stdv)
        b = jax.random.uniform(kb, (4, 1, hidden_sz), jnp.float32, -stdv, stdv)
        layers.append((W, U, b))
    key, kfw, kfb = jax.random.split(key, 3)
    fc_bound = 1.0 / math.sqrt(hidden_sz)
    fc_w = jax.random.uniform(kfw, (hidden_sz, 1), jnp.float32, -fc_bound, fc_bound)
    fc_b = jax.random.uniform(kfb, (1, 1), jnp.float32, -fc_bound, fc_bound)
    return {"layers": layers, "fc_w": fc_w, "fc_b": fc_b}


# ----------------------------------------------------------------------------
# Pure-JAX reference (mirrors the PyTorch forward) for correctness check
# ----------------------------------------------------------------------------
def reference_forward(x_bsi, params):
    x = x_bsi
    h_t = None
    for (W, U, b) in params["layers"]:
        bs, seq, _ = x.shape
        H = W.shape[-1]
        h = jnp.zeros((bs, H), jnp.float32)
        c = jnp.zeros((bs, H), jnp.float32)
        outs = []
        for t in range(seq):
            x_t = x[:, t, :]
            i_t = jax.nn.sigmoid(x_t @ W[0] + h @ U[0] + b[0])
            f_t = jax.nn.sigmoid(x_t @ W[1] + h @ U[1] + b[1])
            g_t = jnp.tanh(x_t @ W[2] + h @ U[2] + b[2])
            c = f_t * c + i_t * g_t
            o_t = jax.nn.sigmoid(x_t @ W[3] + h @ U[3] + b[3])
            h = o_t * jnp.tanh(c)
            outs.append(o_t)
        x = jnp.stack(outs, axis=1)   # (bs, seq, H) — o_t sequence feeds next layer
        h_t = h
    return h_t.reshape(-1, h_t.shape[-1]) @ params["fc_w"] + params["fc_b"]


# ----------------------------------------------------------------------------
if __name__ == "__main__":
    batch, seq, input_sz, hidden_sz, num_layers = 2, 8, 16, 32, 2

    key = jax.random.PRNGKey(0)
    key, kx, kp = jax.random.split(key, 3)
    x = jax.random.normal(kx, (batch, seq, input_sz), jnp.float32)
    params = init_params(kp, input_sz, hidden_sz, num_layers)

    out = lstm_model_forward(x, params)
    out = jax.block_until_ready(out)

    ref = reference_forward(x, params)
    np.testing.assert_allclose(np.asarray(out), np.asarray(ref),
                               rtol=1e-5, atol=1e-5)
    assert out.shape == (batch, 1)

    print("KERNEL_OK")
</pallas_src>

<mosaic_0001>
module attributes {stable_mosaic.version = 11 : i64} {
  func.func @kernel(%arg0: memref<8x2x16xf32, #tpu.memory_space<vmem>>, %arg1: memref<16x128xf32, #tpu.memory_space<vmem>>, %arg2: memref<32x128xf32, #tpu.memory_space<vmem>>, %arg3: memref<1x128xf32, #tpu.memory_space<vmem>>, %arg4: memref<32x128xf32, #tpu.memory_space<vmem>>, %arg5: memref<32x128xf32, #tpu.memory_space<vmem>>, %arg6: memref<1x128xf32, #tpu.memory_space<vmem>>, %arg7: memref<32x128xf32, #tpu.memory_space<vmem>>, %arg8: memref<1x128xf32, #tpu.memory_space<vmem>>, %arg9: memref<2x128xf32, #tpu.memory_space<vmem>>) attributes {dimension_semantics = [], scalar_prefetch = 0 : i64, scratch_operands = 0 : i64, tpu.core_type = #tpu.core_type<tc>} {
    %c0 = arith.constant 0 : index
    %c0_0 = arith.constant 0 : index
    %0 = vector.load %arg1[%c0, %c0_0] : memref<16x128xf32, #tpu.memory_space<vmem>>, vector<16x128xf32>
    %c0_1 = arith.constant 0 : index
    %c0_2 = arith.constant 0 : index
    %1 = vector.load %arg4[%c0_1, %c0_2] : memref<32x128xf32, #tpu.memory_space<vmem>>, vector<32x128xf32>
    %c0_3 = arith.constant 0 : index
    %c0_4 = arith.constant 0 : index
    %2 = vector.load %arg2[%c0_3, %c0_4] : memref<32x128xf32, #tpu.memory_space<vmem>>, vector<32x128xf32>
    %c0_5 = arith.constant 0 : index
    %c0_6 = arith.constant 0 : index
    %3 = vector.load %arg5[%c0_5, %c0_6] : memref<32x128xf32, #tpu.memory_space<vmem>>, vector<32x128xf32>
    %c0_7 = arith.constant 0 : index
    %c0_8 = arith.constant 0 : index
    %4 = vector.load %arg3[%c0_7, %c0_8] : memref<1x128xf32, #tpu.memory_space<vmem>>, vector<1x128xf32>
    %c0_9 = arith.constant 0 : index
    %c0_10 = arith.constant 0 : index
    %5 = vector.load %arg6[%c0_9, %c0_10] : memref<1x128xf32, #tpu.memory_space<vmem>>, vector<1x128xf32>
    %cst = arith.constant 0.000000e+00 : f32
    %6 = vector.broadcast %cst : f32 to vector<2x32xf32>
    %cst_11 = arith.constant 0.000000e+00 : f32
    %7 = vector.broadcast %cst_11 : f32 to vector<2x32xf32>
    %cst_12 = arith.constant 0.000000e+00 : f32
    %8 = vector.broadcast %cst_12 : f32 to vector<2x32xf32>
    %cst_13 = arith.constant 0.000000e+00 : f32
    %9 = vector.broadcast %cst_13 : f32 to vector<2x32xf32>
    %c0_14 = arith.constant 0 : index
    %c0_15 = arith.constant 0 : index
    %c0_16 = arith.constant 0 : index
    %10 = vector.load %arg0[%c0_14, %c0_15, %c0_16] : memref<8x2x16xf32, #tpu.memory_space<vmem>>, vector<1x2x16xf32>
    %11 = vector.shape_cast %10 : vector<1x2x16xf32> to vector<2x16xf32>
    %cst_17 = arith.constant dense<0.000000e+00> : vector<2x128xf32>
    %12 = tpu.matmul %11, %0, %cst_17 {dimension_numbers = #tpu.dot_dimension_numbers<[1], [0], [0], [1], [0, 0, 1, 1], [], []>} : vector<2x16xf32>, vector<16x128xf32>, vector<2x128xf32> -> vector<2x128xf32>
    %cst_18 = arith.constant dense<0.000000e+00> : vector<2x128xf32>
    %13 = tpu.matmul %6, %2, %cst_18 {dimension_numbers = #tpu.dot_dimension_numbers<[1], [0], [0], [1], [0, 0, 1, 1], [], []>} : vector<2x32xf32>, vector<32x128xf32>, vector<2x128xf32> -> vector<2x128xf32>
    %14 = arith.addf %12, %13 : vector<2x128xf32>
    %15 = vector.broadcast %4 : vector<1x128xf32> to vector<2x128xf32>
    %16 = arith.addf %14, %15 : vector<2x128xf32>
    %17 = arith.negf %16 : vector<2x128xf32>
    %18 = math.exp %17 : vector<2x128xf32>
    %cst_19 = arith.constant 1.000000e+00 : f32
    %19 = vector.broadcast %cst_19 : f32 to vector<2x128xf32>
    %20 = arith.addf %19, %18 : vector<2x128xf32>
    %21 = arith.divf %19, %20 : vector<2x128xf32>
    %22 = math.tanh %16 : vector<2x128xf32>
    %23 = vector.extract_strided_slice %21 {offsets = [0, 0], sizes = [2, 32], strides = [1, 1]} : vector<2x128xf32> to vector<2x32xf32>
    %24 = vector.extract_strided_slice %21 {offsets = [0, 32], sizes = [2, 32], strides = [1, 1]} : vector<2x128xf32> to vector<2x32xf32>
    %25 = vector.extract_strided_slice %22 {offsets = [0, 64], sizes = [2, 32], strides = [1, 1]} : vector<2x128xf32> to vector<2x32xf32>
    %26 = vector.extract_strided_slice %21 {offsets = [0, 96], sizes = [2, 32], strides = [1, 1]} : vector<2x128xf32> to vector<2x32xf32>
    %27 = arith.mulf %24, %8 : vector<2x32xf32>
    %28 = arith.mulf %23, %25 : vector<2x32xf32>
    %29 = arith.addf %27, %28 : vector<2x32xf32>
    %30 = math.tanh %29 : vector<2x32xf32>
    %31 = arith.mulf %26, %30 : vector<2x32xf32>
    %c1 = arith.constant 1 : index
    %c0_20 = arith.constant 0 : index
    %c0_21 = arith.constant 0 : index
    %32 = vector.load %arg0[%c1, %c0_20, %c0_21] : memref<8x2x16xf32, #tpu.memory_space<vmem>>, vector<1x2x16xf32>
    %33 = vector.shape_cast %32 : vector<1x2x16xf32> to vector<2x16xf32>
    %cst_22 = arith.constant dense<0.000000e+00> : vector<2x128xf32>
    %34 = tpu.matmul %33, %0, %cst_22 {dimension_numbers = #tpu.dot_dimension_numbers<[1], [0], [0], [1], [0, 0, 1, 1], [], []>} : vector<2x16xf32>, vector<16x128xf32>, vector<2x128xf32> -> vector<2x128xf32>
    %cst_23 = arith.constant dense<0.000000e+00> : vector<2x128xf32>
    %35 = tpu.matmul %31, %2, %cst_23 {dimension_numbers = #tpu.dot_dimension_numbers<[1], [0], [0], [1], [0, 0, 1, 1], [], []>} : vector<2x32xf32>, vector<32x128xf32>, vector<2x128xf32> -> vector<2x128xf32>
    %36 = arith.addf %34, %35 : vector<2x128xf32>
    %37 = vector.broadcast %4 : vector<1x128xf32> to vector<2x128xf32>
    %38 = arith.addf %36, %37 : vector<2x128xf32>
    %39 = arith.negf %38 : vector<2x128xf32>
    %40 = math.exp %39 : vector<2x128xf32>
    %cst_24 = arith.constant 1.000000e+00 : f32
    %41 = vector.broadcast %cst_24 : f32 to vector<2x128xf32>
    %42 = arith.addf %41, %40 : vector<2x128xf32>
    %43 = arith.divf %41, %42 : vector<2x128xf32>
    %44 = math.tanh %38 : vector<2x128xf32>
    %45 = vector.extract_strided_slice %43 {offsets = [0, 0], sizes = [2, 32], strides = [1, 1]} : vector<2x128xf32> to vector<2x32xf32>
    %46 = vector.extract_strided_slice %43 {offsets = [0, 32], sizes = [2, 32], strides = [1, 1]} : vector<2x128xf32> to vector<2x32xf32>
    %47 = vector.extract_strided_slice %44 {offsets = [0, 64], sizes = [2, 32], strides = [1, 1]} : vector<2x128xf32> to vector<2x32xf32>
    %48 = vector.extract_strided_slice %43 {offsets = [0, 96], sizes = [2, 32], strides = [1, 1]} : vector<2x128xf32> to vector<2x32xf32>
    %49 = arith.mulf %46, %29 : vector<2x32xf32>
    %50 = arith.mulf %45, %47 : vector<2x32xf32>
    %51 = arith.addf %49, %50 : vector<2x32xf32>
    %52 = math.tanh %51 : vector<2x32xf32>
    %53 = arith.mulf %48, %52 : vector<2x32xf32>
    %cst_25 = arith.constant dense<0.000000e+00> : vector<2x128xf32>
    %54 = tpu.matmul %26, %1, %cst_25 {dimension_numbers = #tpu.dot_dimension_numbers<[1], [0], [0], [1], [0, 0, 1, 1], [], []>} : vector<2x32xf32>, vector<32x128xf32>, vector<2x128xf32> -> vector<2x128xf32>
    %cst_26 = arith.constant dense<0.000000e+00> : vector<2x128xf32>
    %55 = tpu.matmul %7, %3, %cst_26 {dimension_numbers = #tpu.dot_dimension_numbers<[1], [0], [0], [1], [0, 0, 1, 1], [], []>} : vector<2x32xf32>, vector<32x128xf32>, vector<2x128xf32> -> vector<2x128xf32>
    %56 = arith.addf %54, %55 : vector<2x128xf32>
    %57 = vector.broadcast %5 : vector<1x128xf32> to vector<2x128xf32>
    %58 = arith.addf %56, %57 : vector<2x128xf32>
    %59 = arith.negf %58 : vector<2x128xf32>
    %60 = math.exp %59 : vector<2x128xf32>
    %cst_27 = arith.constant 1.000000e+00 : f32
    %61 = vector.broadcast %cst_27 : f32 to vector<2x128xf32>
    %62 = arith.addf %61, %60 : vector<2x128xf32>
    %63 = arith.divf %61, %62 : vector<2x128xf32>
    %64 = math.tanh %58 : vector<2x128xf32>
    %65 = vector.extract_strided_slice %63 {offsets = [0, 0], sizes = [2, 32], strides = [1, 1]} : vector<2x128xf32> to vector<2x32xf32>
    %66 = vector.extract_strided_slice %63 {offsets = [0, 32], sizes = [2, 32], strides = [1, 1]} : vector<2x128xf32> to vector<2x32xf32>
    %67 = vector.extract_strided_slice %64 {offsets = [0, 64], sizes = [2, 32], strides = [1, 1]} : vector<2x128xf32> to vector<2x32xf32>
    %68 = vector.extract_strided_slice %63 {offsets = [0, 96], sizes = [2, 32], strides = [1, 1]} : vector<2x128xf32> to vector<2x32xf32>
    %69 = arith.mulf %66, %9 : vector<2x32xf32>
    %70 = arith.mulf %65, %67 : vector<2x32xf32>
    %71 = arith.addf %69, %70 : vector<2x32xf32>
    %72 = math.tanh %71 : vector<2x32xf32>
    %73 = arith.mulf %68, %72 : vector<2x32xf32>
    %c2 = arith.constant 2 : index
    %c0_28 = arith.constant 0 : index
    %c0_29 = arith.constant 0 : index
    %74 = vector.load %arg0[%c2, %c0_28, %c0_29] : memref<8x2x16xf32, #tpu.memory_space<vmem>>, vector<1x2x16xf32>
    %75 = vector.shape_cast %74 : vector<1x2x16xf32> to vector<2x16xf32>
    %cst_30 = arith.constant dense<0.000000e+00> : vector<2x128xf32>
    %76 = tpu.matmul %75, %0, %cst_30 {dimension_numbers = #tpu.dot_dimension_numbers<[1], [0], [0], [1], [0, 0, 1, 1], [], []>} : vector<2x16xf32>, vector<16x128xf32>, vector<2x128xf32> -> vector<2x128xf32>
    %cst_31 = arith.constant dense<0.000000e+00> : vector<2x128xf32>
    %77 = tpu.matmul %53, %2, %cst_31 {dimension_numbers = #tpu.dot_dimension_numbers<[1], [0], [0], [1], [0, 0, 1, 1], [], []>} : vector<2x32xf32>, vector<32x128xf32>, vector<2x128xf32> -> vector<2x128xf32>
    %78 = arith.addf %76, %77 : vector<2x128xf32>
    %79 = vector.broadcast %4 : vector<1x128xf32> to vector<2x128xf32>
    %80 = arith.addf %78, %79 : vector<2x128xf32>
    %81 = arith.negf %80 : vector<2x128xf32>
    %82 = math.exp %81 : vector<2x128xf32>
    %cst_32 = arith.constant 1.000000e+00 : f32
    %83 = vector.broadcast %cst_32 : f32 to vector<2x128xf32>
    %84 = arith.addf %83, %82 : vector<2x128xf32>
    %85 = arith.divf %83, %84 : vector<2x128xf32>
    %86 = math.tanh %80 : vector<2x128xf32>
    %87 = vector.extract_strided_slice %85 {offsets = [0, 0], sizes = [2, 32], strides = [1, 1]} : vector<2x128xf32> to vector<2x32xf32>
    %88 = vector.extract_strided_slice %85 {offsets = [0, 32], sizes = [2, 32], strides = [1, 1]} : vector<2x128xf32> to vector<2x32xf32>
    %89 = vector.extract_strided_slice %86 {offsets = [0, 64], sizes = [2, 32], strides = [1, 1]} : vector<2x128xf32> to vector<2x32xf32>
    %90 = vector.extract_strided_slice %85 {offsets = [0, 96], sizes = [2, 32], strides = [1, 1]} : vector<2x128xf32> to vector<2x32xf32>
    %91 = arith.mulf %88, %51 : vector<2x32xf32>
    %92 = arith.mulf %87, %89 : vector<2x32xf32>
    %93 = arith.addf %91, %92 : vector<2x32xf32>
    %94 = math.tanh %93 : vector<2x32xf32>
    %95 = arith.mulf %90, %94 : vector<2x32xf32>
    %cst_33 = arith.constant dense<0.000000e+00> : vector<2x128xf32>
    %96 = tpu.matmul %48, %1, %cst_33 {dimension_numbers = #tpu.dot_dimension_numbers<[1], [0], [0], [1], [0, 0, 1, 1], [], []>} : vector<2x32xf32>, vector<32x128xf32>, vector<2x128xf32> -> vector<2x128xf32>
    %cst_34 = arith.constant dense<0.000000e+00> : vector<2x128xf32>
    %97 = tpu.matmul %73, %3, %cst_34 {dimension_numbers = #tpu.dot_dimension_numbers<[1], [0], [0], [1], [0, 0, 1, 1], [], []>} : vector<2x32xf32>, vector<32x128xf32>, vector<2x128xf32> -> vector<2x128xf32>
    %98 = arith.addf %96, %97 : vector<2x128xf32>
    %99 = vector.broadcast %5 : vector<1x128xf32> to vector<2x128xf32>
    %100 = arith.addf %98, %99 : vector<2x128xf32>
    %101 = arith.negf %100 : vector<2x128xf32>
    %102 = math.exp %101 : vector<2x128xf32>
    %cst_35 = arith.constant 1.000000e+00 : f32
    %103 = vector.broadcast %cst_35 : f32 to vector<2x128xf32>
    %104 = arith.addf %103, %102 : vector<2x128xf32>
    %105 = arith.divf %103, %104 : vector<2x128xf32>
    %106 = math.tanh %100 : vector<2x128xf32>
    %107 = vector.extract_strided_slice %105 {offsets = [0, 0], sizes = [2, 32], strides = [1, 1]} : vector<2x128xf32> to vector<2x32xf32>
    %108 = vector.extract_strided_slice %105 {offsets = [0, 32], sizes = [2, 32], strides = [1, 1]} : vector<2x128xf32> to vector<2x32xf32>
    %109 = vector.extract_strided_slice %106 {offsets = [0, 64], sizes = [2, 32], strides = [1, 1]} : vector<2x128xf32> to vector<2x32xf32>
    %110 = vector.extract_strided_slice %105 {offsets = [0, 96], sizes = [2, 32], strides = [1, 1]} : vector<2x128xf32> to vector<2x32xf32>
    %111 = arith.mulf %108, %71 : vector<2x32xf32>
    %112 = arith.mulf %107, %109 : vector<2x32xf32>
    %113 = arith.addf %111, %112 : vector<2x32xf32>
    %114 = math.tanh %113 : vector<2x32xf32>
    %115 = arith.mulf %110, %114 : vector<2x32xf32>
    %c3 = arith.constant 3 : index
    %c0_36 = arith.constant 0 : index
    %c0_37 = arith.constant 0 : index
    %116 = vector.load %arg0[%c3, %c0_36, %c0_37] : memref<8x2x16xf32, #tpu.memory_space<vmem>>, vector<1x2x16xf32>
    %117 = vector.shape_cast %116 : vector<1x2x16xf32> to vector<2x16xf32>
    %cst_38 = arith.constant dense<0.000000e+00> : vector<2x128xf32>
    %118 = tpu.matmul %117, %0, %cst_38 {dimension_numbers = #tpu.dot_dimension_numbers<[1], [0], [0], [1], [0, 0, 1, 1], [], []>} : vector<2x16xf32>, vector<16x128xf32>, vector<2x128xf32> -> vector<2x128xf32>
    %cst_39 = arith.constant dense<0.000000e+00> : vector<2x128xf32>
    %119 = tpu.matmul %95, %2, %cst_39 {dimension_numbers = #tpu.dot_dimension_numbers<[1], [0], [0], [1], [0, 0, 1, 1], [], []>} : vector<2x32xf32>, vector<32x128xf32>, vector<2x128xf32> -> vector<2x128xf32>
    %120 = arith.addf %118, %119 : vector<2x128xf32>
    %121 = vector.broadcast %4 : vector<1x128xf32> to vector<2x128xf32>
    %122 = arith.addf %120, %121 : vector<2x128xf32>
    %123 = arith.negf %122 : vector<2x128xf32>
    %124 = math.exp %123 : vector<2x128xf32>
    %cst_40 = arith.constant 1.000000e+00 : f32
    %125 = vector.broadcast %cst_40 : f32 to vector<2x128xf32>
    %126 = arith.addf %125, %124 : vector<2x128xf32>
    %127 = arith.divf %125, %126 : vector<2x128xf32>
    %128 = math.tanh %122 : vector<2x128xf32>
    %129 = vector.extract_strided_slice %127 {offsets = [0, 0], sizes = [2, 32], strides = [1, 1]} : vector<2x128xf32> to vector<2x32xf32>
    %130 = vector.extract_strided_slice %127 {offsets = [0, 32], sizes = [2, 32], strides = [1, 1]} : vector<2x128xf32> to vector<2x32xf32>
    %131 = vector.extract_strided_slice %128 {offsets = [0, 64], sizes = [2, 32], strides = [1, 1]} : vector<2x128xf32> to vector<2x32xf32>
    %132 = vector.extract_strided_slice %127 {offsets = [0, 96], sizes = [2, 32], strides = [1, 1]} : vector<2x128xf32> to vector<2x32xf32>
    %133 = arith.mulf %130, %93 : vector<2x32xf32>
    %134 = arith.mulf %129, %131 : vector<2x32xf32>
    %135 = arith.addf %133, %134 : vector<2x32xf32>
    %136 = math.tanh %135 : vector<2x32xf32>
    %137 = arith.mulf %132, %136 : vector<2x32xf32>
    %cst_41 = arith.constant dense<0.000000e+00> : vector<2x128xf32>
    %138 = tpu.matmul %90, %1, %cst_41 {dimension_numbers = #tpu.dot_dimension_numbers<[1], [0], [0], [1], [0, 0, 1, 1], [], []>} : vector<2x32xf32>, vector<32x128xf32>, vector<2x128xf32> -> vector<2x128xf32>
    %cst_42 = arith.constant dense<0.000000e+00> : vector<2x128xf32>
    %139 = tpu.matmul %115, %3, %cst_42 {dimension_numbers = #tpu.dot_dimension_numbers<[1], [0], [0], [1], [0, 0, 1, 1], [], []>} : vector<2x32xf32>, vector<32x128xf32>, vector<2x128xf32> -> vector<2x128xf32>
    %140 = arith.addf %138, %139 : vector<2x128xf32>
    %141 = vector.broadcast %5 : vector<1x128xf32> to vector<2x128xf32>
    %142 = arith.addf %140, %141 : vector<2x128xf32>
    %143 = arith.negf %142 : vector<2x128xf32>
    %144 = math.exp %143 : vector<2x128xf32>
    %cst_43 = arith.constant 1.000000e+00 : f32
    %145 = vector.broadcast %cst_43 : f32 to vector<2x128xf32>
    %146 = arith.addf %145, %144 : vector<2x128xf32>
    %147 = arith.divf %145, %146 : vector<2x128xf32>
    %148 = math.tanh %142 : vector<2x128xf32>
    %149 = vector.extract_strided_slice %147 {offsets = [0, 0], sizes = [2, 32], strides = [1, 1]} : vector<2x128xf32> to vector<2x32xf32>
    %150 = vector.extract_strided_slice %147 {offsets = [0, 32], sizes = [2, 32], strides = [1, 1]} : vector<2x128xf32> to vector<2x32xf32>
    %151 = vector.extract_strided_slice %148 {offsets = [0, 64], sizes = [2, 32], strides = [1, 1]} : vector<2x128xf32> to vector<2x32xf32>
    %152 = vector.extract_strided_slice %147 {offsets = [0, 96], sizes = [2, 32], strides = [1, 1]} : vector<2x128xf32> to vector<2x32xf32>
    %153 = arith.mulf %150, %113 : vector<2x32xf32>
    %154 = arith.mulf %149, %151 : vector<2x32xf32>
    %155 = arith.addf %153, %154 : vector<2x32xf32>
    %156 = math.tanh %155 : vector<2x32xf32>
    %157 = arith.mulf %152, %156 : vector<2x32xf32>
    %c4 = arith.constant 4 : index
    %c0_44 = arith.constant 0 : index
    %c0_45 = arith.constant 0 : index
    %158 = vector.load %arg0[%c4, %c0_44, %c0_45] : memref<8x2x16xf32, #tpu.memory_space<vmem>>, vector<1x2x16xf32>
    %159 = vector.shape_cast %158 : vector<1x2x16xf32> to vector<2x16xf32>
    %cst_46 = arith.constant dense<0.000000e+00> : vector<2x128xf32>
    %160 = tpu.matmul %159, %0, %cst_46 {dimension_numbers = #tpu.dot_dimension_numbers<[1], [0], [0], [1], [0, 0, 1, 1], [], []>} : vector<2x16xf32>, vector<16x128xf32>, vector<2x128xf32> -> vector<2x128xf32>
    %cst_47 = arith.constant dense<0.000000e+00> : vector<2x128xf32>
    %161 = tpu.matmul %137, %2, %cst_47 {dimension_numbers = #tpu.dot_dimension_numbers<[1], [0], [0], [1], [0, 0, 1, 1], [], []>} : vector<2x32xf32>, vector<32x128xf32>, vector<2x128xf32> -> vector<2x128xf32>
    %162 = arith.addf %160, %161 : vector<2x128xf32>
    %163 = vector.broadcast %4 : vector<1x128xf32> to vector<2x128xf32>
    %164 = arith.addf %162, %163 : vector<2x128xf32>
    %165 = arith.negf %164 : vector<2x128xf32>
    %166 = math.exp %165 : vector<2x128xf32>
    %cst_48 = arith.constant 1.000000e+00 : f32
    %167 = vector.broadcast %cst_48 : f32 to vector<2x128xf32>
    %168 = arith.addf %167, %166 : vector<2x128xf32>
    %169 = arith.divf %167, %168 : vector<2x128xf32>
    %170 = math.tanh %164 : vector<2x128xf32>
    %171 = vector.extract_strided_slice %169 {offsets = [0, 0], sizes = [2, 32], strides = [1, 1]} : vector<2x128xf32> to vector<2x32xf32>
    %172 = vector.extract_strided_slice %169 {offsets = [0, 32], sizes = [2, 32], strides = [1, 1]} : vector<2x128xf32> to vector<2x32xf32>
    %173 = vector.extract_strided_slice %170 {offsets = [0, 64], sizes = [2, 32], strides = [1, 1]} : vector<2x128xf32> to vector<2x32xf32>
    %174 = vector.extract_strided_slice %169 {offsets = [0, 96], sizes = [2, 32], strides = [1, 1]} : vector<2x128xf32> to vector<2x32xf32>
    %175 = arith.mulf %172, %135 : vector<2x32xf32>
    %176 = arith.mulf %171, %173 : vector<2x32xf32>
    %177 = arith.addf %175, %176 : vector<2x32xf32>
    %178 = math.tanh %177 : vector<2x32xf32>
    %179 = arith.mulf %174, %178 : vector<2x32xf32>
    %cst_49 = arith.constant dense<0.000000e+00> : vector<2x128xf32>
    %180 = tpu.matmul %132, %1, %cst_49 {dimension_numbers = #tpu.dot_dimension_numbers<[1], [0], [0], [1], [0, 0, 1, 1], [], []>} : vector<2x32xf32>, vector<32x128xf32>, vector<2x128xf32> -> vector<2x128xf32>
    %cst_50 = arith.constant dense<0.000000e+00> : vector<2x128xf32>
    %181 = tpu.matmul %157, %3, %cst_50 {dimension_numbers = #tpu.dot_dimension_numbers<[1], [0], [0], [1], [0, 0, 1, 1], [], []>} : vector<2x32xf32>, vector<32x128xf32>, vector<2x128xf32> -> vector<2x128xf32>
    %182 = arith.addf %180, %181 : vector<2x128xf32>
    %183 = vector.broadcast %5 : vector<1x128xf32> to vector<2x128xf32>
    %184 = arith.addf %182, %183 : vector<2x128xf32>
    %185 = arith.negf %184 : vector<2x128xf32>
    %186 = math.exp %185 : vector<2x128xf32>
    %cst_51 = arith.constant 1.000000e+00 : f32
    %187 = vector.broadcast %cst_51 : f32 to vector<2x128xf32>
    %188 = arith.addf %187, %186 : vector<2x128xf32>
    %189 = arith.divf %187, %188 : vector<2x128xf32>
    %190 = math.tanh %184 : vector<2x128xf32>
    %191 = vector.extract_strided_slice %189 {offsets = [0, 0], sizes = [2, 32], strides = [1, 1]} : vector<2x128xf32> to vector<2x32xf32>
    %192 = vector.extract_strided_slice %189 {offsets = [0, 32], sizes = [2, 32], strides = [1, 1]} : vector<2x128xf32> to vector<2x32xf32>
    %193 = vector.extract_strided_slice %190 {offsets = [0, 64], sizes = [2, 32], strides = [1, 1]} : vector<2x128xf32> to vector<2x32xf32>
    %194 = vector.extract_strided_slice %189 {offsets = [0, 96], sizes = [2, 32], strides = [1, 1]} : vector<2x128xf32> to vector<2x32xf32>
    %195 = arith.mulf %192, %155 : vector<2x32xf32>
    %196 = arith.mulf %191, %193 : vector<2x32xf32>
    %197 = arith.addf %195, %196 : vector<2x32xf32>
    %198 = math.tanh %197 : vector<2x32xf32>
    %199 = arith.mulf %194, %198 : vector<2x32xf32>
    %c5 = arith.constant 5 : index
    %c0_52 = arith.constant 0 : index
    %c0_53 = arith.constant 0 : index
    %200 = vector.load %arg0[%c5, %c0_52, %c0_53] : memref<8x2x16xf32, #tpu.memory_space<vmem>>, vector<1x2x16xf32>
    %201 = vector.shape_cast %200 : vector<1x2x16xf32> to vector<2x16xf32>
    %cst_54 = arith.constant dense<0.000000e+00> : vector<2x128xf32>
    %202 = tpu.matmul %201, %0, %cst_54 {dimension_numbers = #tpu.dot_dimension_numbers<[1], [0], [0], [1], [0, 0, 1, 1], [], []>} : vector<2x16xf32>, vector<16x128xf32>, vector<2x128xf32> -> vector<2x128xf32>
    %cst_55 = arith.constant dense<0.000000e+00> : vector<2x128xf32>
    %203 = tpu.matmul %179, %2, %cst_55 {dimension_numbers = #tpu.dot_dimension_numbers<[1], [0], [0], [1], [0, 0, 1, 1], [], []>} : vector<2x32xf32>, vector<32x128xf32>, vector<2x128xf32> -> vector<2x128xf32>
    %204 = arith.addf %202, %203 : vector<2x128xf32>
    %205 = vector.broadcast %4 : vector<1x128xf32> to vector<2x128xf32>
    %206 = arith.addf %204, %205 : vector<2x128xf32>
    %207 = arith.negf %206 : vector<2x128xf32>
    %208 = math.exp %207 : vector<2x128xf32>
    %cst_56 = arith.constant 1.000000e+00 : f32
    %209 = vector.broadcast %cst_56 : f32 to vector<2x128xf32>
    %210 = arith.addf %209, %208 : vector<2x128xf32>
    %211 = arith.divf %209, %210 : vector<2x128xf32>
    %212 = math.tanh %206 : vector<2x128xf32>
    %213 = vector.extract_strided_slice %211 {offsets = [0, 0], sizes = [2, 32], strides = [1, 1]} : vector<2x128xf32> to vector<2x32xf32>
    %214 = vector.extract_strided_slice %211 {offsets = [0, 32], sizes = [2, 32], strides = [1, 1]} : vector<2x128xf32> to vector<2x32xf32>
    %215 = vector.extract_strided_slice %212 {offsets = [0, 64], sizes = [2, 32], strides = [1, 1]} : vector<2x128xf32> to vector<2x32xf32>
    %216 = vector.extract_strided_slice %211 {offsets = [0, 96], sizes = [2, 32], strides = [1, 1]} : vector<2x128xf32> to vector<2x32xf32>
    %217 = arith.mulf %214, %177 : vector<2x32xf32>
    %218 = arith.mulf %213, %215 : vector<2x32xf32>
    %219 = arith.addf %217, %218 : vector<2x32xf32>
    %220 = math.tanh %219 : vector<2x32xf32>
    %221 = arith.mulf %216, %220 : vector<2x32xf32>
    %cst_57 = arith.constant dense<0.000000e+00> : vector<2x128xf32>
    %222 = tpu.matmul %174, %1, %cst_57 {dimension_numbers = #tpu.dot_dimension_numbers<[1], [0], [0], [1], [0, 0, 1, 1], [], []>} : vector<2x32xf32>, vector<32x128xf32>, vector<2x128xf32> -> vector<2x128xf32>
    %cst_58 = arith.constant dense<0.000000e+00> : vector<2x128xf32>
    %223 = tpu.matmul %199, %3, %cst_58 {dimension_numbers = #tpu.dot_dimension_numbers<[1], [0], [0], [1], [0, 0, 1, 1], [], []>} : vector<2x32xf32>, vector<32x128xf32>, vector<2x128xf32> -> vector<2x128xf32>
    %224 = arith.addf %222, %223 : vector<2x128xf32>
    %225 = vector.broadcast %5 : vector<1x128xf32> to vector<2x128xf32>
    %226 = arith.addf %224, %225 : vector<2x128xf32>
    %227 = arith.negf %226 : vector<2x128xf32>
    %228 = math.exp %227 : vector<2x128xf32>
    %cst_59 = arith.constant 1.000000e+00 : f32
    %229 = vector.broadcast %cst_59 : f32 to vector<2x128xf32>
    %230 = arith.addf %229, %228 : vector<2x128xf32>
    %231 = arith.divf %229, %230 : vector<2x128xf32>
    %232 = math.tanh %226 : vector<2x128xf32>
    %233 = vector.extract_strided_slice %231 {offsets = [0, 0], sizes = [2, 32], strides = [1, 1]} : vector<2x128xf32> to vector<2x32xf32>
    %234 = vector.extract_strided_slice %231 {offsets = [0, 32], sizes = [2, 32], strides = [1, 1]} : vector<2x128xf32> to vector<2x32xf32>
    %235 = vector.extract_strided_slice %232 {offsets = [0, 64], sizes = [2, 32], strides = [1, 1]} : vector<2x128xf32> to vector<2x32xf32>
    %236 = vector.extract_strided_slice %231 {offsets = [0, 96], sizes = [2, 32], strides = [1, 1]} : vector<2x128xf32> to vector<2x32xf32>
    %237 = arith.mulf %234, %197 : vector<2x32xf32>
    %238 = arith.mulf %233, %235 : vector<2x32xf32>
    %239 = arith.addf %237, %238 : vector<2x32xf32>
    %240 = math.tanh %239 : vector<2x32xf32>
    %241 = arith.mulf %236, %240 : vector<2x32xf32>
    %c6 = arith.constant 6 : index
    %c0_60 = arith.constant 0 : index
    %c0_61 = arith.constant 0 : index
    %242 = vector.load %arg0[%c6, %c0_60, %c0_61] : memref<8x2x16xf32, #tpu.memory_space<vmem>>, vector<1x2x16xf32>
    %243 = vector.shape_cast %242 : vector<1x2x16xf32> to vector<2x16xf32>
    %cst_62 = arith.constant dense<0.000000e+00> : vector<2x128xf32>
    %244 = tpu.matmul %243, %0, %cst_62 {dimension_numbers = #tpu.dot_dimension_numbers<[1], [0], [0], [1], [0, 0, 1, 1], [], []>} : vector<2x16xf32>, vector<16x128xf32>, vector<2x128xf32> -> vector<2x128xf32>
    %cst_63 = arith.constant dense<0.000000e+00> : vector<2x128xf32>
    %245 = tpu.matmul %221, %2, %cst_63 {dimension_numbers = #tpu.dot_dimension_numbers<[1], [0], [0], [1], [0, 0, 1, 1], [], []>} : vector<2x32xf32>, vector<32x128xf32>, vector<2x128xf32> -> vector<2x128xf32>
    %246 = arith.addf %244, %245 : vector<2x128xf32>
    %247 = vector.broadcast %4 : vector<1x128xf32> to vector<2x128xf32>
    %248 = arith.addf %246, %247 : vector<2x128xf32>
    %249 = arith.negf %248 : vector<2x128xf32>
    %250 = math.exp %249 : vector<2x128xf32>
    %cst_64 = arith.constant 1.000000e+00 : f32
    %251 = vector.broadcast %cst_64 : f32 to vector<2x128xf32>
    %252 = arith.addf %251, %250 : vector<2x128xf32>
    %253 = arith.divf %251, %252 : vector<2x128xf32>
    %254 = math.tanh %248 : vector<2x128xf32>
    %255 = vector.extract_strided_slice %253 {offsets = [0, 0], sizes = [2, 32], strides = [1, 1]} : vector<2x128xf32> to vector<2x32xf32>
    %256 = vector.extract_strided_slice %253 {offsets = [0, 32], sizes = [2, 32], strides = [1, 1]} : vector<2x128xf32> to vector<2x32xf32>
    %257 = vector.extract_strided_slice %254 {offsets = [0, 64], sizes = [2, 32], strides = [1, 1]} : vector<2x128xf32> to vector<2x32xf32>
    %258 = vector.extract_strided_slice %253 {offsets = [0, 96], sizes = [2, 32], strides = [1, 1]} : vector<2x128xf32> to vector<2x32xf32>
    %259 = arith.mulf %256, %219 : vector<2x32xf32>
    %260 = arith.mulf %255, %257 : vector<2x32xf32>
    %261 = arith.addf %259, %260 : vector<2x32xf32>
    %262 = math.tanh %261 : vector<2x32xf32>
    %263 = arith.mulf %258, %262 : vector<2x32xf32>
    %cst_65 = arith.constant dense<0.000000e+00> : vector<2x128xf32>
    %264 = tpu.matmul %216, %1, %cst_65 {dimension_numbers = #tpu.dot_dimension_numbers<[1], [0], [0], [1], [0, 0, 1, 1], [], []>} : vector<2x32xf32>, vector<32x128xf32>, vector<2x128xf32> -> vector<2x128xf32>
    %cst_66 = arith.constant dense<0.000000e+00> : vector<2x128xf32>
    %265 = tpu.matmul %241, %3, %cst_66 {dimension_numbers = #tpu.dot_dimension_numbers<[1], [0], [0], [1], [0, 0, 1, 1], [], []>} : vector<2x32xf32>, vector<32x128xf32>, vector<2x128xf32> -> vector<2x128xf32>
    %266 = arith.addf %264, %265 : vector<2x128xf32>
    %267 = vector.broadcast %5 : vector<1x128xf32> to vector<2x128xf32>
    %268 = arith.addf %266, %267 : vector<2x128xf32>
    %269 = arith.negf %268 : vector<2x128xf32>
    %270 = math.exp %269 : vector<2x128xf32>
    %cst_67 = arith.constant 1.000000e+00 : f32
    %271 = vector.broadcast %cst_67 : f32 to vector<2x128xf32>
    %272 = arith.addf %271, %270 : vector<2x128xf32>
    %273 = arith.divf %271, %272 : vector<2x128xf32>
    %274 = math.tanh %268 : vector<2x128xf32>
    %275 = vector.extract_strided_slice %273 {offsets = [0, 0], sizes = [2, 32], strides = [1, 1]} : vector<2x128xf32> to vector<2x32xf32>
    %276 = vector.extract_strided_slice %273 {offsets = [0, 32], sizes = [2, 32], strides = [1, 1]} : vector<2x128xf32> to vector<2x32xf32>
    %277 = vector.extract_strided_slice %274 {offsets = [0, 64], sizes = [2, 32], strides = [1, 1]} : vector<2x128xf32> to vector<2x32xf32>
    %278 = vector.extract_strided_slice %273 {offsets = [0, 96], sizes = [2, 32], strides = [1, 1]} : vector<2x128xf32> to vector<2x32xf32>
    %279 = arith.mulf %276, %239 : vector<2x32xf32>
    %280 = arith.mulf %275, %277 : vector<2x32xf32>
    %281 = arith.addf %279, %280 : vector<2x32xf32>
    %282 = math.tanh %281 : vector<2x32xf32>
    %283 = arith.mulf %278, %282 : vector<2x32xf32>
    %c7 = arith.constant 7 : index
    %c0_68 = arith.constant 0 : index
    %c0_69 = arith.constant 0 : index
    %284 = vector.load %arg0[%c7, %c0_68, %c0_69] : memref<8x2x16xf32, #tpu.memory_space<vmem>>, vector<1x2x16xf32>
    %285 = vector.shape_cast %284 : vector<1x2x16xf32> to vector<2x16xf32>
    %cst_70 = arith.constant dense<0.000000e+00> : vector<2x128xf32>
    %286 = tpu.matmul %285, %0, %cst_70 {dimension_numbers = #tpu.dot_dimension_numbers<[1], [0], [0], [1], [0, 0, 1, 1], [], []>} : vector<2x16xf32>, vector<16x128xf32>, vector<2x128xf32> -> vector<2x128xf32>
    %cst_71 = arith.constant dense<0.000000e+00> : vector<2x128xf32>
    %287 = tpu.matmul %263, %2, %cst_71 {dimension_numbers = #tpu.dot_dimension_numbers<[1], [0], [0], [1], [0, 0, 1, 1], [], []>} : vector<2x32xf32>, vector<32x128xf32>, vector<2x128xf32> -> vector<2x128xf32>
    %288 = arith.addf %286, %287 : vector<2x128xf32>
    %289 = vector.broadcast %4 : vector<1x128xf32> to vector<2x128xf32>
    %290 = arith.addf %288, %289 : vector<2x128xf32>
    %291 = arith.negf %290 : vector<2x128xf32>
    %292 = math.exp %291 : vector<2x128xf32>
    %cst_72 = arith.constant 1.000000e+00 : f32
    %293 = vector.broadcast %cst_72 : f32 to vector<2x128xf32>
    %294 = arith.addf %293, %292 : vector<2x128xf32>
    %295 = arith.divf %293, %294 : vector<2x128xf32>
    %296 = vector.extract_strided_slice %295 {offsets = [0, 96], sizes = [2, 32], strides = [1, 1]} : vector<2x128xf32> to vector<2x32xf32>
    %cst_73 = arith.constant dense<0.000000e+00> : vector<2x128xf32>
    %297 = tpu.matmul %258, %1, %cst_73 {dimension_numbers = #tpu.dot_dimension_numbers<[1], [0], [0], [1], [0, 0, 1, 1], [], []>} : vector<2x32xf32>, vector<32x128xf32>, vector<2x128xf32> -> vector<2x128xf32>
    %cst_74 = arith.constant dense<0.000000e+00> : vector<2x128xf32>
    %298 = tpu.matmul %283, %3, %cst_74 {dimension_numbers = #tpu.dot_dimension_numbers<[1], [0], [0], [1], [0, 0, 1, 1], [], []>} : vector<2x32xf32>, vector<32x128xf32>, vector<2x128xf32> -> vector<2x128xf32>
    %299 = arith.addf %297, %298 : vector<2x128xf32>
    %300 = vector.broadcast %5 : vector<1x128xf32> to vector<2x128xf32>
    %301 = arith.addf %299, %300 : vector<2x128xf32>
    %302 = arith.negf %301 : vector<2x128xf32>
    %303 = math.exp %302 : vector<2x128xf32>
    %cst_75 = arith.constant 1.000000e+00 : f32
    %304 = vector.broadcast %cst_75 : f32 to vector<2x128xf32>
    %305 = arith.addf %304, %303 : vector<2x128xf32>
    %306 = arith.divf %304, %305 : vector<2x128xf32>
    %307 = math.tanh %301 : vector<2x128xf32>
    %308 = vector.extract_strided_slice %306 {offsets = [0, 0], sizes = [2, 32], strides = [1, 1]} : vector<2x128xf32> to vector<2x32xf32>
    %309 = vector.extract_strided_slice %306 {offsets = [0, 32], sizes = [2, 32], strides = [1, 1]} : vector<2x128xf32> to vector<2x32xf32>
    %310 = vector.extract_strided_slice %307 {offsets = [0, 64], sizes = [2, 32], strides = [1, 1]} : vector<2x128xf32> to vector<2x32xf32>
    %311 = vector.extract_strided_slice %306 {offsets = [0, 96], sizes = [2, 32], strides = [1, 1]} : vector<2x128xf32> to vector<2x32xf32>
    %312 = arith.mulf %309, %281 : vector<2x32xf32>
    %313 = arith.mulf %308, %310 : vector<2x32xf32>
    %314 = arith.addf %312, %313 : vector<2x32xf32>
    %315 = math.tanh %314 : vector<2x32xf32>
    %316 = arith.mulf %311, %315 : vector<2x32xf32>
    %cst_76 = arith.constant dense<0.000000e+00> : vector<2x128xf32>
    %317 = tpu.matmul %296, %1, %cst_76 {dimension_numbers = #tpu.dot_dimension_numbers<[1], [0], [0], [1], [0, 0, 1, 1], [], []>} : vector<2x32xf32>, vector<32x128xf32>, vector<2x128xf32> -> vector<2x128xf32>
    %cst_77 = arith.constant dense<0.000000e+00> : vector<2x128xf32>
    %318 = tpu.matmul %316, %3, %cst_77 {dimension_numbers = #tpu.dot_dimension_numbers<[1], [0], [0], [1], [0, 0, 1, 1], [], []>} : vector<2x32xf32>, vector<32x128xf32>, vector<2x128xf32> -> vector<2x128xf32>
    %319 = arith.addf %317, %318 : vector<2x128xf32>
    %320 = vector.broadcast %5 : vector<1x128xf32> to vector<2x128xf32>
    %321 = arith.addf %319, %320 : vector<2x128xf32>
    %322 = arith.negf %321 : vector<2x128xf32>
    %323 = math.exp %322 : vector<2x128xf32>
    %cst_78 = arith.constant 1.000000e+00 : f32
    %324 = vector.broadcast %cst_78 : f32 to vector<2x128xf32>
    %325 = arith.addf %324, %323 : vector<2x128xf32>
    %326 = arith.divf %324, %325 : vector<2x128xf32>
    %327 = math.tanh %321 : vector<2x128xf32>
    %328 = vector.extract_strided_slice %326 {offsets = [0, 0], sizes = [2, 32], strides = [1, 1]} : vector<2x128xf32> to vector<2x32xf32>
    %329 = vector.extract_strided_slice %326 {offsets = [0, 32], sizes = [2, 32], strides = [1, 1]} : vector<2x128xf32> to vector<2x32xf32>
    %330 = vector.extract_strided_slice %327 {offsets = [0, 64], sizes = [2, 32], strides = [1, 1]} : vector<2x128xf32> to vector<2x32xf32>
    %331 = vector.extract_strided_slice %326 {offsets = [0, 96], sizes = [2, 32], strides = [1, 1]} : vector<2x128xf32> to vector<2x32xf32>
    %332 = arith.mulf %329, %314 : vector<2x32xf32>
    %333 = arith.mulf %328, %330 : vector<2x32xf32>
    %334 = arith.addf %332, %333 : vector<2x32xf32>
    %335 = math.tanh %334 : vector<2x32xf32>
    %336 = arith.mulf %331, %335 : vector<2x32xf32>
    %c0_79 = arith.constant 0 : index
    %c0_80 = arith.constant 0 : index
    %337 = vector.load %arg7[%c0_79, %c0_80] : memref<32x128xf32, #tpu.memory_space<vmem>>, vector<32x128xf32>
    %cst_81 = arith.constant dense<0.000000e+00> : vector<2x128xf32>
    %338 = tpu.matmul %336, %337, %cst_81 {dimension_numbers = #tpu.dot_dimension_numbers<[1], [0], [0], [1], [0, 0, 1, 1], [], []>} : vector<2x32xf32>, vector<32x128xf32>, vector<2x128xf32> -> vector<2x128xf32>
    %c0_82 = arith.constant 0 : index
    %c0_83 = arith.constant 0 : index
    %339 = vector.load %arg8[%c0_82, %c0_83] : memref<1x128xf32, #tpu.memory_space<vmem>>, vector<1x128xf32>
    %340 = vector.broadcast %339 : vector<1x128xf32> to vector<2x128xf32>
    %341 = arith.addf %338, %340 : vector<2x128xf32>
    %c0_84 = arith.constant 0 : index
    %c0_85 = arith.constant 0 : index
    %342 = vector.load %arg9[%c0_84, %c0_85] : memref<2x128xf32, #tpu.memory_space<vmem>>, vector<2x128xf32>
    tpu.vector_store %arg9[%c0_84, %c0_85], %341 {strides = array<i32>} : memref<2x128xf32, #tpu.memory_space<vmem>>, vector<2x128xf32>,
    return
  }
}

</mosaic_0001>

<bundles_post_ra>
// kernel: lstm_model_forward.1
= control target key start
LH: loop header
LB: loop body
LE: loop exit
PB: predicated region body
PF: predicated region fallthrough
CT: control target
= control target key end

     0   :  { %v3769_v0 = vmov 0.0|0.0   ;;  %vm3770_vm0 = vmmov 0   ;;  %v3771_v8 = vmov 0.0   ;;  %vm123_vm1 = vcmask 130048   ;;  %s3772_s23 = smov 64   ;;  %s3773_s24 = smov 32   ;;  %s4281_s2 = inlined_call_operand.vmem [shape: f32[32,128], index: 2, kind: input, shape index: {}]   ;;  %s4282_s1 = inlined_call_operand.vmem [shape: f32[16,128], index: 1, kind: input, shape index: {}]   ;;  %s4283_s0 = inlined_call_operand.vmem [shape: f32[8,2,16], index: 0, kind: input, shape index: {}]   ;;  %s4284_s3 = inlined_call_operand.vmem [shape: f32[1,128], index: 3, kind: input, shape index: {}]   ;;  %s4285_s5 = inlined_call_operand.vmem [shape: f32[32,128], index: 5, kind: input, shape index: {}]   ;;  %s4286_s4 = inlined_call_operand.vmem [shape: f32[32,128], index: 4, kind: input, shape index: {}]   ;;  %s4287_s6 = inlined_call_operand.vmem [shape: f32[1,128], index: 6, kind: input, shape index: {}]   ;;  %s4288_s7 = inlined_call_operand.vmem [shape: f32[32,128], index: 7, kind: input, shape index: {}]   ;;  %s4289_s8 = inlined_call_operand.vmem [shape: f32[1,128], index: 8, kind: input, shape index: {}]   ;;  %s4290_s9 = inlined_call_operand.vmem [shape: f32[2,128], index: 9, kind: output, shape index: {}]  }
   0x1   :  { %3464 = vmatprep.subr.bf16.mxu0 %v3769_v0  ;;  %v38_v1 = vld [vmem:[%s4281_s2] sm:$0xff]  ;;  %v39_v2 = vld [vmem:[%s4281_s2 + $0x8] sm:$0xff]  ;;  %3470 = vmatprep.subr.bf16.mxu1 %v3769_v0  ;;  %v40_v6 = vld [vmem:[%s4281_s2 + $0x10] sm:$0xff]  ;;  %vm49_vm2 = vcmask 261120  }
   0x2   :  { %v32_v3 = vld [vmem:[%s4282_s1] sm:$0xff]  ;;  %v3835_v4 = vpack.c.bf16 %v39_v2, %v38_v1  ;;  %v33_v5 = vld [vmem:[%s4282_s1 + $0x8] sm:$0xff]  ;;  %v41_v7 = vld [vmem:[%s4281_s2 + $0x18] sm:$0xff]  ;;  %3148 = vmatprep.mubr.msk.f32.mxu1 %vm3770_vm0, %v3771_v8  ;;  %3141 = vmatprep.mubr.msk.f32.mxu0 %vm3770_vm0, %v3771_v8 }
   0x3   :  { %v3850_v9 = vpack.c.bf16 %v33_v5, %v32_v3  ;;  %v3853_v10 = vpack.c.bf16 %v41_v7, %v40_v6  ;;  %v48_v11 = vld [vmem:[%s4283_s0] sm:$0x3]  ;;  %v43_v31 = vld [vmem:[%s4285_s5 + $0x8] sm:$0xff]  ;;  %v44_v33 = vld [vmem:[%s4285_s5 + $0x10] sm:$0xff] }
   0x4   :  { %3466 = vmatpush3.bf16.msra.mxu0 %v3835_v4  ;;  %v3876_v14 = vld [vmem:[%s4284_s3] ss:$0 sm:$0xff]  ;;  %v45_v34 = vld [vmem:[%s4285_s5 + $0x18] sm:$0xff]  ;;  %v35_v39 = vld [vmem:[%s4286_s4 + $0x8] sm:$0xff] }
   0x5   :  { %3467 = vmatprep.subr.bf16.mxu0 %v3769_v0  ;;  %3472 = vmatpush3.bf16.msra.mxu1 %v3850_v9  ;;  %v42_v30 = vld [vmem:[%s4285_s5] sm:$0xff]  ;;  %v3902_v35 = vpack.c.bf16 %v45_v34, %v44_v33  ;;  %v36_v43 = vld [vmem:[%s4286_s4 + $0x10] sm:$0xff]  ;;  %v37_v44 = vld [vmem:[%s4286_s4 + $0x18] sm:$0xff] }
   0x6   :  { %3473 = vmatprep.subr.bf16.mxu1 %v3769_v0  ;;  %v3892_v32 = vpack.c.bf16 %v43_v31, %v42_v30  ;;  %v34_v38 = vld [vmem:[%s4286_s4] sm:$0xff]  ;;  %v3938_v45 = vpack.c.bf16 %v37_v44, %v36_v43 }
   0x7   :  { %v2930_v41 = vld [vmem:[%s4283_s0 + $0x2] sm:$0x3]  ;;  %v3927_v42 = vpack.c.bf16 %v35_v39, %v34_v38  ;;  %v3954_v55 = vld [vmem:[%s4287_s6] ss:$0 sm:$0xff] }
   0x8   :  { %3469 = vmatpush3.bf16.msra.mxu0 %v3853_v10  ;;  %3149 = vmatmul.mubr.msk.f32.vlgmr.msra.gmra.mrb[0].mxu1 %vm123_vm1, %v48_v11 }
   0x9   :  { %3475 = vmatpush3.bf16.msra.mxu1 %v3835_v4  ;;  %3159 = vmatprep.mubr.msk.f32.mxu1 %vm3770_vm0, %v3771_v8 }
   0xa   :  { %3476 = vmatprep.subr.bf16.mxu1 %v3769_v0  ;;  %3482 = vmatprep.subr.bf16.mxu0 %v3769_v0 }
   0xb   :  { %3142 = vmatmul.mubr.f32.vlgmr.msra.gmra.mrb[0].mxu0 %v3771_v8 }
   0xc   :  { %3177 = vmatprep.mubr.msk.f32.mxu0 %vm3770_vm0, %v3771_v8  ;;  %3484 = vmatpush3.bf16.msra.mxu0 %v3892_v32 }
   0xd   :  { %3478 = vmatpush3.bf16.msra.mxu1 %v3853_v10  ;;  %3485 = vmatprep.subr.bf16.mxu0 %v3769_v0 }
   0xe   :  { %3479 = vmatprep.subr.bf16.mxu1 %v3769_v0 }
  0x10   :  { %3487 = vmatpush3.bf16.msra.mxu0 %v3902_v35 }
  0x11   :  { %3494 = vmatprep.subr.bf16.mxu0 %v3769_v0 }
  0x13   :  { %3178 = vmatmul.mubr.f32.vlgmr.msra.gmra.mrb[2].mxu0 %v3771_v8 }
  0x14   :  { %3496 = vmatpush3.bf16.msra.mxu0 %v3835_v4  ;;  %3199 = vmatprep.mubr.msk.f32.mxu0 %vm3770_vm0, %v3771_v8 }
  0x15   :  { %3497 = vmatprep.subr.bf16.mxu0 %v3769_v0 }
  0x18   :  { %3499 = vmatpush3.bf16.msra.mxu0 %v3853_v10 }
  0x19   :  { %3509 = vmatprep.subr.bf16.mxu0 %v3769_v0 }
  0xdb   :  { %v193_v12 = vpop.f32.mrb[0].mxu1 }
  0xdc   :  { %v3150_v13 = vpop.f32.mrb[1].mxu1 }
  0xde   :  { %v119_v15 = vpop.f32.mrb[0].mxu0 }
  0xdf   :  { %v194_v16 = vadd.f32 %v193_v12, %v119_v15  ;;  %v3143_v17 = vpop.f32.mrb[1].mxu0 }
  0xe1   :  { %v203_v18 = vadd.f32 %v3876_v14, %v194_v16 }
  0xe3   :  { %3643 = vtanh.f32 %v203_v18  ;;  %v2929_v20 = vmul.f32 -1.442695, %v203_v18 }
  0xe5   :  { %3645 = vpow2.f32 %v2929_v20 }
  0xe6   :  { %v469_v47 = vpop.f32.mrb[2].mxu0 }
  0xe7   :  { %v3179_v48 = vpop.f32.mrb[3].mxu0 }
  0xed   :  { %v3644_v19 = vpop.eup %3643 }
  0xee   :  { %213 = vrot.lane.b32.xlu0 %v3644_v19, %s3772_s23 }
  0xef   :  { %v3646_v21 = vpop.eup %3645 }
  0xf0   :  { %v207_v22 = vadd.f32 1.0, %v3646_v21 }
  0xf2   :  { %3647 = vrcp.f32 %v207_v22  ;;  %v2937_v22 = vld [vmem:[%s4283_s0 + $0x4] sm:$0x3] }
  0xfc   :  { %v3648_v23 = vpop.eup %3647 }
  0xfd   :  { %v211_v26 = vmul.f32 0.0, %v3648_v23 }
 0x160   :  { %v214_v24 = vpop.permute.xlu0 %213 }
 0x161   :  { %v216_v25 = vmul.f32 %v3648_v23, %v214_v24 }
 0x163   :  { %218 = vrot.lane.b32.xlu0 %v216_v25, %s3773_s24 }
 0x167   :  { %474 = vrot.lane.b32.xlu0 %v3648_v23, %s3773_s24 }
 0x1d5   :  { %v219_v27 = vpop.permute.xlu0 %218 }
 0x1d6   :  { %v3882_v28 = vadd.f32 %v219_v27, %v211_v26 }
 0x1d8   :  { %3649 = vtanh.f32 %v3882_v28 }
 0x1d9   :  { %v475_v46 = vpop.permute.xlu0 %474 }
 0x1e2   :  { %v3650_v29 = vpop.eup %3649 }
 0x1e3   :  { %224 = vrot.lane.b32.xlu1 %v3650_v29, %s3772_s23 }
 0x255   :  { %v225_v36 = vpop.permute.xlu1 %224 }
 0x256   :  { %v227_v37 = vmul.f32 %v3648_v23, %v225_v36 }
 0x258   :  { %231 = vrot.lane.b32.xlu1 %v227_v37, %s3773_s24 }
 0x2ca   :  { %v232_v40 = vpop.permute.xlu1 %231 }
 0x2cb   :  { %3160 = vmatmul.mubr.msk.f32.vlgmr.msra.gmra.mrb[2].mxu1 %vm49_vm2, %v232_v40 }
 0x2cc   :  { %3481 = vmatpush3.bf16.msra.mxu1 %v3850_v9  ;;  %3166 = vmatprep.mubr.msk.f32.mxu1 %vm3770_vm0, %v3771_v8 }
 0x2cd   :  { %3488 = vmatprep.subr.bf16.mxu1 %v3769_v0 }
 0x2cf   :  { %3167 = vmatmul.mubr.msk.f32.vlgmr.msra.gmra.mrb[4].mxu1 %vm123_vm1, %v2930_v41 }
 0x2d0   :  { %3490 = vmatpush3.bf16.msra.mxu1 %v3927_v42  ;;  %3188 = vmatprep.mubr.msk.f32.mxu1 %vm3770_vm0, %v3771_v8 }
 0x2d1   :  { %3491 = vmatprep.subr.bf16.mxu1 %v3769_v0 }
 0x2d4   :  { %3493 = vmatpush3.bf16.msra.mxu1 %v3938_v45 }
 0x2d5   :  { %3500 = vmatprep.subr.bf16.mxu1 %v3769_v0 }
 0x2d7   :  { %3189 = vmatmul.mubr.msk.f32.vlgmr.msra.gmra.mrb[6].mxu1 %vm49_vm2, %v475_v46 }
 0x2d8   :  { %3502 = vmatpush3.bf16.msra.mxu1 %v3850_v9  ;;  %3206 = vmatprep.mubr.msk.f32.mxu1 %vm3770_vm0, %v3771_v8 }
 0x2d9   :  { %3503 = vmatprep.subr.bf16.mxu1 %v3769_v0 }
 0x2db   :  { %3207 = vmatmul.mubr.msk.f32.vlgmr.msra.gmra.mrb[8].mxu1 %vm123_vm1, %v2937_v22 }
 0x2dc   :  { %3505 = vmatpush3.bf16.msra.mxu1 %v3892_v32  ;;  %3217 = vmatprep.mubr.msk.f32.mxu1 %vm3770_vm0, %v3771_v8 }
 0x2dd   :  { %3506 = vmatprep.subr.bf16.mxu1 %v3769_v0 }
 0x2e0   :  { %3508 = vmatpush3.bf16.msra.mxu1 %v3902_v35 }
 0x2e1   :  { %3515 = vmatprep.subr.bf16.mxu1 %v3769_v0 }
 0x39e   :  { %v301_v49 = vpop.f32.mrb[2].mxu1 }
 0x39f   :  { %v3161_v50 = vpop.f32.mrb[3].mxu1 }
 0x3a2   :  { %v374_v51 = vpop.f32.mrb[4].mxu1 }
 0x3a3   :  { %v375_v52 = vadd.f32 %v374_v51, %v301_v49  ;;  %v3168_v53 = vpop.f32.mrb[5].mxu1 }
 0x3a5   :  { %v378_v54 = vadd.f32 %v3876_v14, %v375_v52 }
 0x3a7   :  { %3651 = vtanh.f32 %v378_v54  ;;  %v2933_v62 = vmul.f32 -1.442695, %v378_v54 }
 0x3aa   :  { %v544_v56 = vpop.f32.mrb[6].mxu1 }
 0x3ab   :  { %v545_v57 = vadd.f32 %v544_v56, %v469_v47  ;;  %v3190_v58 = vpop.f32.mrb[7].mxu1 }
 0x3ad   :  { %v554_v59 = vadd.f32 %v3954_v55, %v545_v57 }
 0x3ae   :  { %v725_v29 = vpop.f32.mrb[8].mxu1 }
 0x3af   :  { %3653 = vtanh.f32 %v554_v59  ;;  %v2936_v63 = vmul.f32 -1.442695, %v554_v59  ;;  %v3208_v30 = vpop.f32.mrb[9].mxu1 }
 0x3b0   :  { %3655 = vpow2.f32 %v2933_v62 }
 0x3b1   :  { %v3652_v60 = vpop.eup %3651  ;;  %3657 = vpow2.f32 %v2936_v63 }
 0x3b2   :  { %388 = vrot.lane.b32.xlu1 %v3652_v60, %s3772_s23 }
 0x3b9   :  { %v3654_v61 = vpop.eup %3653 }
 0x3ba   :  { %564 = vrot.lane.b32.xlu0 %v3654_v61, %s3772_s23  ;;  %v3656_v1 = vpop.eup %3655 }
 0x3bb   :  { %v382_v2 = vadd.f32 1.0, %v3656_v1  ;;  %v3658_v3 = vpop.eup %3657 }
 0x3bc   :  { %v558_v5 = vadd.f32 1.0, %v3658_v3 }
 0x3bd   :  { %3659 = vrcp.f32 %v382_v2 }
 0x3be   :  { %3661 = vrcp.f32 %v558_v5 }
 0x3c7   :  { %v3660_v6 = vpop.eup %3659 }
 0x3c8   :  { %v3662_v12 = vpop.eup %3661  ;;  %v386_v16 = vmul.f32 %v3660_v6, %v3882_v28 }
 0x3c9   :  { %v562_v19 = vmul.f32 0.0, %v3662_v12 }
 0x424   :  { %v389_v7 = vpop.permute.xlu1 %388 }
 0x425   :  { %v391_v11 = vmul.f32 %v3660_v6, %v389_v7  ;;  %v2944_v7 = vld [vmem:[%s4283_s0 + $0x6] sm:$0x3] }
 0x427   :  { %393 = vrot.lane.b32.xlu1 %v391_v11, %s3773_s24 }
 0x42c   :  { %v565_v13 = vpop.permute.xlu0 %564 }
 0x42d   :  { %v567_v15 = vmul.f32 %v3662_v12, %v565_v13 }
 0x42f   :  { %569 = vrot.lane.b32.xlu0 %v567_v15, %s3773_s24 }
 0x499   :  { %v394_v17 = vpop.permute.xlu1 %393 }
 0x49a   :  { %v3962_v18 = vadd.f32 %v394_v17, %v386_v16 }
 0x49c   :  { %3663 = vtanh.f32 %v3962_v18 }
 0x4a1   :  { %v570_v20 = vpop.permute.xlu0 %569 }
 0x4a2   :  { %v3965_v21 = vadd.f32 %v570_v20, %v562_v19 }
 0x4a4   :  { %3665 = vtanh.f32 %v3965_v21 }
 0x4a6   :  { %v3664_v23 = vpop.eup %3663 }
 0x4a7   :  { %399 = vrot.lane.b32.xlu1 %v3664_v23, %s3772_s23 }
 0x4ae   :  { %v3666_v24 = vpop.eup %3665 }
 0x4af   :  { %575 = vrot.lane.b32.xlu0 %v3666_v24, %s3772_s23 }
 0x519   :  { %v400_v25 = vpop.permute.xlu1 %399 }
 0x51a   :  { %v402_v26 = vmul.f32 %v3660_v6, %v400_v25 }
 0x51c   :  { %582 = vrot.lane.b32.xlu1 %v402_v26, %s3773_s24 }
 0x520   :  { %830 = vrot.lane.b32.xlu1 %v3660_v6, %s3773_s24 }
 0x521   :  { %v576_v27 = vpop.permute.xlu0 %575 }
 0x522   :  { %v578_v28 = vmul.f32 %v3662_v12, %v576_v27 }
 0x524   :  { %755 = vrot.lane.b32.xlu0 %v578_v28, %s3773_s24 }
 0x58e   :  { %v583_v31 = vpop.permute.xlu1 %582 }
 0x58f   :  { %3200 = vmatmul.mubr.msk.f32.vlgmr.msra.gmra.mrb[4].mxu0 %vm49_vm2, %v583_v31 }
 0x590   :  { %3511 = vmatpush3.bf16.msra.mxu0 %v3927_v42  ;;  %3228 = vmatprep.mubr.msk.f32.mxu0 %vm3770_vm0, %v3771_v8 }
 0x591   :  { %3512 = vmatprep.subr.bf16.mxu0 %v3769_v0 }
 0x592   :  { %v831_v33 = vpop.permute.xlu1 %830 }
 0x594   :  { %3514 = vmatpush3.bf16.msra.mxu0 %v3938_v45 }
 0x595   :  { %3521 = vmatprep.subr.bf16.mxu0 %v3769_v0 }
 0x596   :  { %v756_v34 = vpop.permute.xlu0 %755 }
 0x597   :  { %3218 = vmatmul.mubr.msk.f32.vlgmr.msra.gmra.mrb[10].mxu1 %vm49_vm2, %v756_v34  ;;  %3229 = vmatmul.mubr.msk.f32.vlgmr.msra.gmra.mrb[6].mxu0 %vm49_vm2, %v831_v33 }
 0x598   :  { %3517 = vmatpush3.bf16.msra.mxu1 %v3835_v4  ;;  %3523 = vmatpush3.bf16.msra.mxu0 %v3850_v9 }
 0x599   :  { %3518 = vmatprep.subr.bf16.mxu1 %v3769_v0  ;;  %3246 = vmatprep.mubr.msk.f32.mxu0 %vm3770_vm0, %v3771_v8 }
 0x59a   :  { %3239 = vmatprep.mubr.msk.f32.mxu1 %vm3770_vm0, %v3771_v8  ;;  %3524 = vmatprep.subr.bf16.mxu0 %v3769_v0 }
 0x59b   :  { %3247 = vmatmul.mubr.msk.f32.vlgmr.msra.gmra.mrb[8].mxu0 %vm123_vm1, %v2944_v7 }
 0x59c   :  { %3520 = vmatpush3.bf16.msra.mxu1 %v3853_v10  ;;  %3526 = vmatpush3.bf16.msra.mxu0 %v3892_v32 }
 0x59d   :  { %3530 = vmatprep.subr.bf16.mxu1 %v3769_v0  ;;  %3257 = vmatprep.mubr.msk.f32.mxu0 %vm3770_vm0, %v3771_v8 }
 0x59e   :  { %3527 = vmatprep.subr.bf16.mxu0 %v3769_v0 }
 0x5a0   :  { %3529 = vmatpush3.bf16.msra.mxu0 %v3902_v35 }
 0x5a1   :  { %3536 = vmatprep.subr.bf16.mxu0 %v3769_v0 }
 0x662   :  { %v652_v36 = vpop.f32.mrb[4].mxu0 }
 0x663   :  { %v726_v37 = vadd.f32 %v725_v29, %v652_v36  ;;  %v3201_v38 = vpop.f32.mrb[5].mxu0 }
 0x665   :  { %v729_v39 = vadd.f32 %v3876_v14, %v726_v37 }
 0x667   :  { %3667 = vtanh.f32 %v729_v39  ;;  %v2940_v50 = vmul.f32 -1.442695, %v729_v39 }
 0x66a   :  { %v825_v40 = vpop.f32.mrb[10].mxu1  ;;  %v900_v41 = vpop.f32.mrb[6].mxu0 }
 0x66b   :  { %v901_v43 = vadd.f32 %v900_v41, %v825_v40  ;;  %v3219_v44 = vpop.f32.mrb[11].mxu1  ;;  %v3230_v46 = vpop.f32.mrb[7].mxu0 }
 0x66d   :  { %v904_v47 = vadd.f32 %v3954_v55, %v901_v43 }
 0x66f   :  { %3669 = vtanh.f32 %v904_v47  ;;  %v2943_v51 = vmul.f32 -1.442695, %v904_v47 }
 0x670   :  { %3671 = vpow2.f32 %v2940_v50 }
 0x671   :  { %v3668_v48 = vpop.eup %3667  ;;  %3673 = vpow2.f32 %v2943_v51 }
 0x672   :  { %739 = vrot.lane.b32.xlu0 %v3668_v48, %s3772_s23 }
 0x679   :  { %v3670_v49 = vpop.eup %3669 }
 0x67a   :  { %914 = vrot.lane.b32.xlu1 %v3670_v49, %s3772_s23  ;;  %v3672_v52 = vpop.eup %3671 }
 0x67b   :  { %v733_v53 = vadd.f32 1.0, %v3672_v52  ;;  %v3674_v54 = vpop.eup %3673 }
 0x67c   :  { %v908_v56 = vadd.f32 1.0, %v3674_v54 }
 0x67d   :  { %3675 = vrcp.f32 %v733_v53 }
 0x67e   :  { %3677 = vrcp.f32 %v908_v56 }
 0x687   :  { %v3676_v57 = vpop.eup %3675 }
 0x688   :  { %v3678_v60 = vpop.eup %3677  ;;  %v737_v63 = vmul.f32 %v3676_v57, %v3962_v18  ;;  %v1075_v18 = vpop.f32.mrb[8].mxu0 }
 0x689   :  { %v912_v3 = vmul.f32 %v3678_v60, %v3965_v21  ;;  %v3248_v19 = vpop.f32.mrb[9].mxu0 }
 0x6e4   :  { %v740_v58 = vpop.permute.xlu0 %739 }
 0x6e5   :  { %v742_v59 = vmul.f32 %v3676_v57, %v740_v58  ;;  %v2951_v58 = vld [vmem:[%s4283_s0 + $0x8] sm:$0x3] }
 0x6e7   :  { %744 = vrot.lane.b32.xlu0 %v742_v59, %s3773_s24 }
 0x6ec   :  { %v915_v61 = vpop.permute.xlu1 %914 }
 0x6ed   :  { %v917_v62 = vmul.f32 %v3678_v60, %v915_v61 }
 0x6ef   :  { %919 = vrot.lane.b32.xlu1 %v917_v62, %s3773_s24 }
 0x759   :  { %v745_v1 = vpop.permute.xlu0 %744 }
 0x75a   :  { %v4009_v2 = vadd.f32 %v745_v1, %v737_v63 }
 0x75c   :  { %3679 = vtanh.f32 %v4009_v2 }
 0x761   :  { %v920_v5 = vpop.permute.xlu1 %919 }
 0x762   :  { %v4013_v6 = vadd.f32 %v920_v5, %v912_v3 }
 0x764   :  { %3681 = vtanh.f32 %v4013_v6 }
 0x766   :  { %v3680_v11 = vpop.eup %3679 }
 0x767   :  { %750 = vrot.lane.b32.xlu0 %v3680_v11, %s3772_s23 }
 0x76e   :  { %v3682_v12 = vpop.eup %3681 }
 0x76f   :  { %925 = vrot.lane.b32.xlu1 %v3682_v12, %s3772_s23 }
 0x7d9   :  { %v751_v13 = vpop.permute.xlu0 %750 }
 0x7da   :  { %v753_v15 = vmul.f32 %v3676_v57, %v751_v13 }
 0x7dc   :  { %932 = vrot.lane.b32.xlu0 %v753_v15, %s3773_s24 }
 0x7e0   :  { %1180 = vrot.lane.b32.xlu0 %v3676_v57, %s3773_s24 }
 0x7e1   :  { %v926_v16 = vpop.permute.xlu1 %925 }
 0x7e2   :  { %v928_v17 = vmul.f32 %v3678_v60, %v926_v16 }
 0x7e4   :  { %1105 = vrot.lane.b32.xlu1 %v928_v17, %s3773_s24 }
 0x84e   :  { %v933_v20 = vpop.permute.xlu0 %932 }
 0x84f   :  { %3240 = vmatmul.mubr.msk.f32.vlgmr.msra.gmra.mrb[12].mxu1 %vm49_vm2, %v933_v20 }
 0x850   :  { %3532 = vmatpush3.bf16.msra.mxu1 %v3927_v42  ;;  %3268 = vmatprep.mubr.msk.f32.mxu1 %vm3770_vm0, %v3771_v8 }
 0x851   :  { %3533 = vmatprep.subr.bf16.mxu1 %v3769_v0 }
 0x852   :  { %v1181_v21 = vpop.permute.xlu0 %1180 }
 0x854   :  { %3535 = vmatpush3.bf16.msra.mxu1 %v3938_v45 }
 0x855   :  { %3542 = vmatprep.subr.bf16.mxu1 %v3769_v0 }
 0x856   :  { %v1106_v22 = vpop.permute.xlu1 %1105 }
 0x857   :  { %3258 = vmatmul.mubr.msk.f32.vlgmr.msra.gmra.mrb[10].mxu0 %vm49_vm2, %v1106_v22  ;;  %3269 = vmatmul.mubr.msk.f32.vlgmr.msra.gmra.mrb[14].mxu1 %vm49_vm2, %v1181_v21 }
 0x858   :  { %3538 = vmatpush3.bf16.msra.mxu0 %v3835_v4  ;;  %3544 = vmatpush3.bf16.msra.mxu1 %v3850_v9 }
 0x859   :  { %3539 = vmatprep.subr.bf16.mxu0 %v3769_v0  ;;  %3286 = vmatprep.mubr.msk.f32.mxu1 %vm3770_vm0, %v3771_v8 }
 0x85a   :  { %3279 = vmatprep.mubr.msk.f32.mxu0 %vm3770_vm0, %v3771_v8  ;;  %3545 = vmatprep.subr.bf16.mxu1 %v3769_v0 }
 0x85b   :  { %3287 = vmatmul.mubr.msk.f32.vlgmr.msra.gmra.mrb[16].mxu1 %vm123_vm1, %v2951_v58 }
 0x85c   :  { %3541 = vmatpush3.bf16.msra.mxu0 %v3853_v10  ;;  %3547 = vmatpush3.bf16.msra.mxu1 %v3892_v32 }
 0x85d   :  { %3551 = vmatprep.subr.bf16.mxu0 %v3769_v0  ;;  %3297 = vmatprep.mubr.msk.f32.mxu1 %vm3770_vm0, %v3771_v8 }
 0x85e   :  { %3548 = vmatprep.subr.bf16.mxu1 %v3769_v0 }
 0x860   :  { %3550 = vmatpush3.bf16.msra.mxu1 %v3902_v35 }
 0x861   :  { %3557 = vmatprep.subr.bf16.mxu1 %v3769_v0 }
 0x922   :  { %v1002_v23 = vpop.f32.mrb[12].mxu1 }
 0x923   :  { %v1076_v24 = vadd.f32 %v1075_v18, %v1002_v23  ;;  %v3241_v25 = vpop.f32.mrb[13].mxu1 }
 0x925   :  { %v1079_v26 = vadd.f32 %v3876_v14, %v1076_v24 }
 0x927   :  { %3683 = vtanh.f32 %v1079_v26  ;;  %v2947_v37 = vmul.f32 -1.442695, %v1079_v26 }
 0x92a   :  { %v1175_v27 = vpop.f32.mrb[10].mxu0  ;;  %v1250_v28 = vpop.f32.mrb[14].mxu1 }
 0x92b   :  { %v1251_v29 = vadd.f32 %v1250_v28, %v1175_v27  ;;  %v3259_v30 = vpop.f32.mrb[11].mxu0  ;;  %v3270_v31 = vpop.f32.mrb[15].mxu1 }
 0x92d   :  { %v1254_v33 = vadd.f32 %v3954_v55, %v1251_v29 }
 0x92f   :  { %3685 = vtanh.f32 %v1254_v33  ;;  %v2950_v38 = vmul.f32 -1.442695, %v1254_v33 }
 0x930   :  { %3687 = vpow2.f32 %v2947_v37 }
 0x931   :  { %v3684_v34 = vpop.eup %3683  ;;  %3689 = vpow2.f32 %v2950_v38 }
 0x932   :  { %1089 = vrot.lane.b32.xlu1 %v3684_v34, %s3772_s23 }
 0x939   :  { %v3686_v36 = vpop.eup %3685 }
 0x93a   :  { %1264 = vrot.lane.b32.xlu0 %v3686_v36, %s3772_s23  ;;  %v3688_v39 = vpop.eup %3687 }
 0x93b   :  { %v1083_v40 = vadd.f32 1.0, %v3688_v39  ;;  %v3690_v41 = vpop.eup %3689 }
 0x93c   :  { %v1258_v43 = vadd.f32 1.0, %v3690_v41 }
 0x93d   :  { %3691 = vrcp.f32 %v1083_v40 }
 0x93e   :  { %3693 = vrcp.f32 %v1258_v43 }
 0x947   :  { %v3692_v44 = vpop.eup %3691 }
 0x948   :  { %v3694_v48 = vpop.eup %3693  ;;  %v1087_v51 = vmul.f32 %v3692_v44, %v4009_v2  ;;  %v1425_v2 = vpop.f32.mrb[16].mxu1 }
 0x949   :  { %v1262_v54 = vmul.f32 %v3694_v48, %v4013_v6  ;;  %v3288_v3 = vpop.f32.mrb[17].mxu1 }
 0x9a4   :  { %v1090_v46 = vpop.permute.xlu1 %1089 }
 0x9a5   :  { %v1092_v47 = vmul.f32 %v3692_v44, %v1090_v46  ;;  %v2958_v46 = vld [vmem:[%s4283_s0 + $0xa] sm:$0x3] }
 0x9a7   :  { %1094 = vrot.lane.b32.xlu1 %v1092_v47, %s3773_s24 }
 0x9ac   :  { %v1265_v49 = vpop.permute.xlu0 %1264 }
 0x9ad   :  { %v1267_v50 = vmul.f32 %v3694_v48, %v1265_v49 }
 0x9af   :  { %1269 = vrot.lane.b32.xlu0 %v1267_v50, %s3773_s24 }
 0xa19   :  { %v1095_v52 = vpop.permute.xlu1 %1094 }
 0xa1a   :  { %v4057_v53 = vadd.f32 %v1095_v52, %v1087_v51 }
 0xa1c   :  { %3695 = vtanh.f32 %v4057_v53 }
 0xa21   :  { %v1270_v56 = vpop.permute.xlu0 %1269 }
 0xa22   :  { %v4061_v57 = vadd.f32 %v1270_v56, %v1262_v54 }
 0xa24   :  { %3697 = vtanh.f32 %v4061_v57 }
 0xa26   :  { %v3696_v59 = vpop.eup %3695 }
 0xa27   :  { %1100 = vrot.lane.b32.xlu1 %v3696_v59, %s3772_s23 }
 0xa2e   :  { %v3698_v60 = vpop.eup %3697 }
 0xa2f   :  { %1275 = vrot.lane.b32.xlu0 %v3698_v60, %s3772_s23 }
 0xa99   :  { %v1101_v61 = vpop.permute.xlu1 %1100 }
 0xa9a   :  { %v1103_v62 = vmul.f32 %v3692_v44, %v1101_v61 }
 0xa9c   :  { %1282 = vrot.lane.b32.xlu1 %v1103_v62, %s3773_s24 }
 0xaa0   :  { %1530 = vrot.lane.b32.xlu1 %v3692_v44, %s3773_s24 }
 0xaa1   :  { %v1276_v63 = vpop.permute.xlu0 %1275 }
 0xaa2   :  { %v1278_v1 = vmul.f32 %v3694_v48, %v1276_v63 }
 0xaa4   :  { %1455 = vrot.lane.b32.xlu0 %v1278_v1, %s3773_s24 }
 0xb0e   :  { %v1283_v5 = vpop.permute.xlu1 %1282 }
 0xb0f   :  { %3280 = vmatmul.mubr.msk.f32.vlgmr.msra.gmra.mrb[12].mxu0 %vm49_vm2, %v1283_v5 }
 0xb10   :  { %3553 = vmatpush3.bf16.msra.mxu0 %v3927_v42  ;;  %3308 = vmatprep.mubr.msk.f32.mxu0 %vm3770_vm0, %v3771_v8 }
 0xb11   :  { %3554 = vmatprep.subr.bf16.mxu0 %v3769_v0 }
 0xb12   :  { %v1531_v6 = vpop.permute.xlu1 %1530 }
 0xb14   :  { %3556 = vmatpush3.bf16.msra.mxu0 %v3938_v45 }
 0xb15   :  { %3563 = vmatprep.subr.bf16.mxu0 %v3769_v0 }
 0xb16   :  { %v1456_v7 = vpop.permute.xlu0 %1455 }
 0xb17   :  { %3298 = vmatmul.mubr.msk.f32.vlgmr.msra.gmra.mrb[18].mxu1 %vm49_vm2, %v1456_v7  ;;  %3309 = vmatmul.mubr.msk.f32.vlgmr.msra.gmra.mrb[14].mxu0 %vm49_vm2, %v1531_v6 }
 0xb18   :  { %3559 = vmatpush3.bf16.msra.mxu1 %v3835_v4  ;;  %3565 = vmatpush3.bf16.msra.mxu0 %v3850_v9 }
 0xb19   :  { %3560 = vmatprep.subr.bf16.mxu1 %v3769_v0  ;;  %3326 = vmatprep.mubr.msk.f32.mxu0 %vm3770_vm0, %v3771_v8 }
 0xb1a   :  { %3319 = vmatprep.mubr.msk.f32.mxu1 %vm3770_vm0, %v3771_v8  ;;  %3566 = vmatprep.subr.bf16.mxu0 %v3769_v0 }
 0xb1b   :  { %3327 = vmatmul.mubr.msk.f32.vlgmr.msra.gmra.mrb[16].mxu0 %vm123_vm1, %v2958_v46 }
 0xb1c   :  { %3562 = vmatpush3.bf16.msra.mxu1 %v3853_v10  ;;  %3568 = vmatpush3.bf16.msra.mxu0 %v3892_v32 }
 0xb1d   :  { %3572 = vmatprep.subr.bf16.mxu1 %v3769_v0  ;;  %3337 = vmatprep.mubr.msk.f32.mxu0 %vm3770_vm0, %v3771_v8 }
 0xb1e   :  { %3569 = vmatprep.subr.bf16.mxu0 %v3769_v0 }
 0xb20   :  { %3571 = vmatpush3.bf16.msra.mxu0 %v3902_v35 }
 0xb21   :  { %3578 = vmatprep.subr.bf16.mxu0 %v3769_v0 }
 0xbe2   :  { %v1352_v11 = vpop.f32.mrb[12].mxu0 }
 0xbe3   :  { %v1426_v12 = vadd.f32 %v1425_v2, %v1352_v11  ;;  %v3281_v13 = vpop.f32.mrb[13].mxu0 }
 0xbe5   :  { %v1429_v15 = vadd.f32 %v3876_v14, %v1426_v12 }
 0xbe7   :  { %3699 = vtanh.f32 %v1429_v15  ;;  %v2954_v24 = vmul.f32 -1.442695, %v1429_v15 }
 0xbea   :  { %v1525_v16 = vpop.f32.mrb[18].mxu1  ;;  %v1600_v17 = vpop.f32.mrb[14].mxu0 }
 0xbeb   :  { %v1601_v18 = vadd.f32 %v1600_v17, %v1525_v16  ;;  %v3299_v19 = vpop.f32.mrb[19].mxu1  ;;  %v3310_v20 = vpop.f32.mrb[15].mxu0 }
 0xbed   :  { %v1604_v21 = vadd.f32 %v3954_v55, %v1601_v18 }
 0xbef   :  { %3701 = vtanh.f32 %v1604_v21  ;;  %v2957_v25 = vmul.f32 -1.442695, %v1604_v21 }
 0xbf0   :  { %3703 = vpow2.f32 %v2954_v24 }
 0xbf1   :  { %v3700_v22 = vpop.eup %3699  ;;  %3705 = vpow2.f32 %v2957_v25 }
 0xbf2   :  { %1439 = vrot.lane.b32.xlu0 %v3700_v22, %s3772_s23 }
 0xbf9   :  { %v3702_v23 = vpop.eup %3701 }
 0xbfa   :  { %1614 = vrot.lane.b32.xlu1 %v3702_v23, %s3772_s23  ;;  %v3704_v26 = vpop.eup %3703 }
 0xbfb   :  { %v1433_v27 = vadd.f32 1.0, %v3704_v26  ;;  %v3706_v28 = vpop.eup %3705 }
 0xbfc   :  { %v1608_v29 = vadd.f32 1.0, %v3706_v28 }
 0xbfd   :  { %3707 = vrcp.f32 %v1433_v27 }
 0xbfe   :  { %3709 = vrcp.f32 %v1608_v29 }
 0xc07   :  { %v3708_v30 = vpop.eup %3707 }
 0xc08   :  { %v3710_v34 = vpop.eup %3709  ;;  %v1437_v38 = vmul.f32 %v3708_v30, %v4057_v53  ;;  %v1775_v53 = vpop.f32.mrb[16].mxu0 }
 0xc09   :  { %v1612_v41 = vmul.f32 %v3710_v34, %v4061_v57  ;;  %v3328_v54 = vpop.f32.mrb[17].mxu0 }
 0xc64   :  { %v1440_v31 = vpop.permute.xlu0 %1439 }
 0xc65   :  { %v1442_v33 = vmul.f32 %v3708_v30, %v1440_v31  ;;  %v2965_v31 = vld [vmem:[%s4283_s0 + $0xc] sm:$0x3] }
 0xc67   :  { %1444 = vrot.lane.b32.xlu0 %v1442_v33, %s3773_s24 }
 0xc6c   :  { %v1615_v36 = vpop.permute.xlu1 %1614 }
 0xc6d   :  { %v1617_v37 = vmul.f32 %v3710_v34, %v1615_v36 }
 0xc6f   :  { %1619 = vrot.lane.b32.xlu1 %v1617_v37, %s3773_s24 }
 0xcd9   :  { %v1445_v39 = vpop.permute.xlu0 %1444 }
 0xcda   :  { %v4105_v40 = vadd.f32 %v1445_v39, %v1437_v38 }
 0xcdc   :  { %3711 = vtanh.f32 %v4105_v40 }
 0xce1   :  { %v1620_v43 = vpop.permute.xlu1 %1619 }
 0xce2   :  { %v4109_v44 = vadd.f32 %v1620_v43, %v1612_v41 }
 0xce4   :  { %3713 = vtanh.f32 %v4109_v44 }
 0xce6   :  { %v3712_v47 = vpop.eup %3711 }
 0xce7   :  { %1450 = vrot.lane.b32.xlu0 %v3712_v47, %s3772_s23 }
 0xcee   :  { %v3714_v48 = vpop.eup %3713 }
 0xcef   :  { %1625 = vrot.lane.b32.xlu1 %v3714_v48, %s3772_s23 }
 0xd59   :  { %v1451_v49 = vpop.permute.xlu0 %1450 }
 0xd5a   :  { %v1453_v50 = vmul.f32 %v3708_v30, %v1451_v49 }
 0xd5c   :  { %1632 = vrot.lane.b32.xlu0 %v1453_v50, %s3773_s24 }
 0xd60   :  { %1880 = vrot.lane.b32.xlu0 %v3708_v30, %s3773_s24 }
 0xd61   :  { %v1626_v51 = vpop.permute.xlu1 %1625 }
 0xd62   :  { %v1628_v52 = vmul.f32 %v3710_v34, %v1626_v51 }
 0xd64   :  { %1805 = vrot.lane.b32.xlu1 %v1628_v52, %s3773_s24 }
 0xdce   :  { %v1633_v56 = vpop.permute.xlu0 %1632 }
 0xdcf   :  { %3320 = vmatmul.mubr.msk.f32.vlgmr.msra.gmra.mrb[20].mxu1 %vm49_vm2, %v1633_v56 }
 0xdd0   :  { %3574 = vmatpush3.bf16.msra.mxu1 %v3927_v42  ;;  %3348 = vmatprep.mubr.msk.f32.mxu1 %vm3770_vm0, %v3771_v8 }
 0xdd1   :  { %3575 = vmatprep.subr.bf16.mxu1 %v3769_v0 }
 0xdd2   :  { %v1881_v57 = vpop.permute.xlu0 %1880 }
 0xdd4   :  { %3577 = vmatpush3.bf16.msra.mxu1 %v3938_v45 }
 0xdd5   :  { %3584 = vmatprep.subr.bf16.mxu1 %v3769_v0 }
 0xdd6   :  { %v1806_v58 = vpop.permute.xlu1 %1805 }
 0xdd7   :  { %3338 = vmatmul.mubr.msk.f32.vlgmr.msra.gmra.mrb[18].mxu0 %vm49_vm2, %v1806_v58  ;;  %3349 = vmatmul.mubr.msk.f32.vlgmr.msra.gmra.mrb[22].mxu1 %vm49_vm2, %v1881_v57 }
 0xdd8   :  { %3580 = vmatpush3.bf16.msra.mxu0 %v3835_v4  ;;  %3586 = vmatpush3.bf16.msra.mxu1 %v3850_v9 }
 0xdd9   :  { %3581 = vmatprep.subr.bf16.mxu0 %v3769_v0  ;;  %3366 = vmatprep.mubr.msk.f32.mxu1 %vm3770_vm0, %v3771_v8 }
 0xdda   :  { %3359 = vmatprep.mubr.msk.f32.mxu0 %vm3770_vm0, %v3771_v8  ;;  %3587 = vmatprep.subr.bf16.mxu1 %v3769_v0 }
 0xddb   :  { %3367 = vmatmul.mubr.msk.f32.vlgmr.msra.gmra.mrb[24].mxu1 %vm123_vm1, %v2965_v31 }
 0xddc   :  { %3583 = vmatpush3.bf16.msra.mxu0 %v3853_v10  ;;  %3589 = vmatpush3.bf16.msra.mxu1 %v3892_v32 }
 0xddd   :  { %3593 = vmatprep.subr.bf16.mxu0 %v3769_v0  ;;  %3377 = vmatprep.mubr.msk.f32.mxu1 %vm3770_vm0, %v3771_v8 }
 0xdde   :  { %3590 = vmatprep.subr.bf16.mxu1 %v3769_v0 }
 0xde0   :  { %3592 = vmatpush3.bf16.msra.mxu1 %v3902_v35 }
 0xde1   :  { %3599 = vmatprep.subr.bf16.mxu1 %v3769_v0 }
 0xea2   :  { %v1702_v59 = vpop.f32.mrb[20].mxu1 }
 0xea3   :  { %v1776_v60 = vadd.f32 %v1775_v53, %v1702_v59  ;;  %v3321_v61 = vpop.f32.mrb[21].mxu1 }
 0xea5   :  { %v1779_v62 = vadd.f32 %v3876_v14, %v1776_v60 }
 0xea7   :  { %3715 = vtanh.f32 %v1779_v62  ;;  %v2961_v12 = vmul.f32 -1.442695, %v1779_v62 }
 0xeaa   :  { %v1875_v63 = vpop.f32.mrb[18].mxu0  ;;  %v1950_v1 = vpop.f32.mrb[22].mxu1 }
 0xeab   :  { %v1951_v2 = vadd.f32 %v1950_v1, %v1875_v63  ;;  %v3339_v3 = vpop.f32.mrb[19].mxu0  ;;  %v3350_v5 = vpop.f32.mrb[23].mxu1 }
 0xead   :  { %v1954_v6 = vadd.f32 %v3954_v55, %v1951_v2 }
 0xeaf   :  { %3717 = vtanh.f32 %v1954_v6  ;;  %v2964_v13 = vmul.f32 -1.442695, %v1954_v6 }
 0xeb0   :  { %3719 = vpow2.f32 %v2961_v12 }
 0xeb1   :  { %v3716_v7 = vpop.eup %3715  ;;  %3721 = vpow2.f32 %v2964_v13 }
 0xeb2   :  { %1789 = vrot.lane.b32.xlu1 %v3716_v7, %s3772_s23 }
 0xeb9   :  { %v3718_v11 = vpop.eup %3717 }
 0xeba   :  { %1964 = vrot.lane.b32.xlu0 %v3718_v11, %s3772_s23  ;;  %v3720_v15 = vpop.eup %3719 }
 0xebb   :  { %v1783_v16 = vadd.f32 1.0, %v3720_v15  ;;  %v3722_v17 = vpop.eup %3721 }
 0xebc   :  { %v1958_v18 = vadd.f32 1.0, %v3722_v17 }
 0xebd   :  { %3723 = vrcp.f32 %v1783_v16  ;;  %v2972_v16 = vld [vmem:[%s4283_s0 + $0xe] sm:$0x3] }
 0xebe   :  { %3725 = vrcp.f32 %v1958_v18 }
 0xec7   :  { %v3724_v19 = vpop.eup %3723 }
 0xec8   :  { %v3726_v22 = vpop.eup %3725  ;;  %v1787_v25 = vmul.f32 %v3724_v19, %v4105_v40  ;;  %v2125_v40 = vpop.f32.mrb[24].mxu1 }
 0xec9   :  { %v1962_v28 = vmul.f32 %v3726_v22, %v4109_v44  ;;  %v3368_v41 = vpop.f32.mrb[25].mxu1 }
 0xf24   :  { %v1790_v20 = vpop.permute.xlu1 %1789 }
 0xf25   :  { %v1792_v21 = vmul.f32 %v3724_v19, %v1790_v20 }
 0xf27   :  { %1794 = vrot.lane.b32.xlu1 %v1792_v21, %s3773_s24 }
 0xf2c   :  { %v1965_v23 = vpop.permute.xlu0 %1964 }
 0xf2d   :  { %v1967_v24 = vmul.f32 %v3726_v22, %v1965_v23 }
 0xf2f   :  { %1969 = vrot.lane.b32.xlu0 %v1967_v24, %s3773_s24 }
 0xf99   :  { %v1795_v26 = vpop.permute.xlu1 %1794 }
 0xf9a   :  { %v4153_v27 = vadd.f32 %v1795_v26, %v1787_v25 }
 0xf9c   :  { %3727 = vtanh.f32 %v4153_v27 }
 0xfa1   :  { %v1970_v29 = vpop.permute.xlu0 %1969 }
 0xfa2   :  { %v4157_v30 = vadd.f32 %v1970_v29, %v1962_v28 }
 0xfa4   :  { %3729 = vtanh.f32 %v4157_v30 }
 0xfa6   :  { %v3728_v33 = vpop.eup %3727 }
 0xfa7   :  { %1800 = vrot.lane.b32.xlu1 %v3728_v33, %s3772_s23 }
 0xfae   :  { %v3730_v34 = vpop.eup %3729 }
 0xfaf   :  { %1975 = vrot.lane.b32.xlu0 %v3730_v34, %s3772_s23 }
0x1019   :  { %v1801_v36 = vpop.permute.xlu1 %1800 }
0x101a   :  { %v1803_v37 = vmul.f32 %v3724_v19, %v1801_v36 }
0x101c   :  { %1982 = vrot.lane.b32.xlu1 %v1803_v37, %s3773_s24 }
0x1020   :  { %2230 = vrot.lane.b32.xlu1 %v3724_v19, %s3773_s24 }
0x1021   :  { %v1976_v38 = vpop.permute.xlu0 %1975 }
0x1022   :  { %v1978_v39 = vmul.f32 %v3726_v22, %v1976_v38 }
0x1024   :  { %2155 = vrot.lane.b32.xlu0 %v1978_v39, %s3773_s24 }
0x108e   :  { %v1983_v43 = vpop.permute.xlu1 %1982 }
0x108f   :  { %3360 = vmatmul.mubr.msk.f32.vlgmr.msra.gmra.mrb[20].mxu0 %vm49_vm2, %v1983_v43  ;;  %v3767_v43 = vld [vmem:[%s4284_s3] ss:$0 sm:$0xff] }
0x1090   :  { %3595 = vmatpush3.bf16.msra.mxu0 %v3927_v42  ;;  %3388 = vmatprep.mubr.msk.f32.mxu0 %vm3770_vm0, %v3771_v8 }
0x1091   :  { %3596 = vmatprep.subr.bf16.mxu0 %v3769_v0 }
0x1092   :  { %v2231_v44 = vpop.permute.xlu1 %2230 }
0x1094   :  { %3598 = vmatpush3.bf16.msra.mxu0 %v3938_v45 }
0x1095   :  { %3605 = vmatprep.subr.bf16.mxu0 %v3769_v0 }
0x1096   :  { %v2156_v46 = vpop.permute.xlu0 %2155 }
0x1097   :  { %3378 = vmatmul.mubr.msk.f32.vlgmr.msra.gmra.mrb[26].mxu1 %vm49_vm2, %v2156_v46  ;;  %3389 = vmatmul.mubr.msk.f32.vlgmr.msra.gmra.mrb[22].mxu0 %vm49_vm2, %v2231_v44 }
0x1098   :  { %3601 = vmatpush3.bf16.msra.mxu1 %v3835_v4  ;;  %3607 = vmatpush3.bf16.msra.mxu0 %v3850_v9 }
0x1099   :  { %3602 = vmatprep.subr.bf16.mxu1 %v3769_v0  ;;  %3406 = vmatprep.mubr.msk.f32.mxu0 %vm3770_vm0, %v3771_v8 }
0x109a   :  { %3399 = vmatprep.mubr.msk.f32.mxu1 %vm3770_vm0, %v3771_v8  ;;  %3608 = vmatprep.subr.bf16.mxu0 %v3769_v0 }
0x109b   :  { %3407 = vmatmul.mubr.msk.f32.vlgmr.msra.gmra.mrb[24].mxu0 %vm123_vm1, %v2972_v16  ;;  %v2839_v16 = vld [vmem:[%s4288_s7 + $0x18] sm:$0xff] }
0x109c   :  { %3604 = vmatpush3.bf16.msra.mxu1 %v3853_v10  ;;  %3610 = vmatpush3.bf16.msra.mxu0 %v3892_v32 }
0x109d   :  { %3614 = vmatprep.subr.bf16.mxu1 %v3769_v0  ;;  %3417 = vmatprep.mubr.msk.f32.mxu0 %vm3770_vm0, %v3771_v8 }
0x109e   :  { %3611 = vmatprep.subr.bf16.mxu0 %v3769_v0 }
0x10a0   :  { %3613 = vmatpush3.bf16.msra.mxu0 %v3902_v35 }
0x10a1   :  { %3620 = vmatprep.subr.bf16.mxu0 %v3769_v0 }
0x1162   :  { %v2052_v47 = vpop.f32.mrb[20].mxu0 }
0x1163   :  { %v2126_v48 = vadd.f32 %v2125_v40, %v2052_v47  ;;  %v3361_v49 = vpop.f32.mrb[21].mxu0 }
0x1165   :  { %v2129_v4 = vadd.f32 %v3876_v14, %v2126_v48 }
0x1167   :  { %3731 = vtanh.f32 %v2129_v4  ;;  %v2968_v57 = vmul.f32 -1.442695, %v2129_v4 }
0x116a   :  { %v2225_v9 = vpop.f32.mrb[26].mxu1  ;;  %v2300_v50 = vpop.f32.mrb[22].mxu0 }
0x116b   :  { %v2301_v51 = vadd.f32 %v2300_v50, %v2225_v9  ;;  %v3379_v52 = vpop.f32.mrb[27].mxu1  ;;  %v3390_v53 = vpop.f32.mrb[23].mxu0 }
0x116d   :  { %v2304_v54 = vadd.f32 %v3954_v55, %v2301_v51 }
0x116e   :  { %v2475_v23 = vpop.f32.mrb[24].mxu0 }
0x116f   :  { %3733 = vtanh.f32 %v2304_v54  ;;  %v2971_v58 = vmul.f32 -1.442695, %v2304_v54  ;;  %v3408_v24 = vpop.f32.mrb[25].mxu0 }
0x1170   :  { %3735 = vpow2.f32 %v2968_v57 }
0x1171   :  { %v3732_v56 = vpop.eup %3731  ;;  %3737 = vpow2.f32 %v2971_v58 }
0x1172   :  { %2139 = vrot.lane.b32.xlu0 %v3732_v56, %s3772_s23 }
0x1179   :  { %v3734_v10 = vpop.eup %3733 }
0x117a   :  { %2314 = vrot.lane.b32.xlu1 %v3734_v10, %s3772_s23  ;;  %v3736_v14 = vpop.eup %3735 }
0x117b   :  { %v2133_v59 = vadd.f32 1.0, %v3736_v14  ;;  %v3738_v60 = vpop.eup %3737 }
0x117c   :  { %v2308_v61 = vadd.f32 1.0, %v3738_v60 }
0x117d   :  { %3739 = vrcp.f32 %v2133_v59  ;;  %v3768_v59 = vld [vmem:[%s4287_s6] ss:$0 sm:$0xff] }
0x117e   :  { %3741 = vrcp.f32 %v2308_v61 }
0x1187   :  { %v3740_v62 = vpop.eup %3739 }
0x1188   :  { %v3742_v2 = vpop.eup %3741  ;;  %v2137_v6 = vmul.f32 %v3740_v62, %v4153_v27 }
0x1189   :  { %v2312_v12 = vmul.f32 %v3742_v2, %v4157_v30 }
0x11e4   :  { %v2140_v63 = vpop.permute.xlu0 %2139 }
0x11e5   :  { %v2142_v1 = vmul.f32 %v3740_v62, %v2140_v63 }
0x11e7   :  { %2144 = vrot.lane.b32.xlu0 %v2142_v1, %s3773_s24 }
0x11ec   :  { %v2315_v3 = vpop.permute.xlu1 %2314 }
0x11ed   :  { %v2317_v5 = vmul.f32 %v3742_v2, %v2315_v3 }
0x11ef   :  { %2319 = vrot.lane.b32.xlu1 %v2317_v5, %s3773_s24 }
0x1259   :  { %v2145_v7 = vpop.permute.xlu0 %2144 }
0x125a   :  { %v2147_v11 = vadd.f32 %v2145_v7, %v2137_v6 }
0x125c   :  { %3743 = vtanh.f32 %v2147_v11  ;;  %v2836_v11 = vld [vmem:[%s4288_s7] sm:$0xff] }
0x1261   :  { %v2320_v13 = vpop.permute.xlu1 %2319 }
0x1262   :  { %v4202_v15 = vadd.f32 %v2320_v13, %v2312_v12  ;;  %v2837_v12 = vld [vmem:[%s4288_s7 + $0x8] sm:$0xff]  ;;  %v2838_v13 = vld [vmem:[%s4288_s7 + $0x10] sm:$0xff] }
0x1264   :  { %3745 = vtanh.f32 %v4202_v15 }
0x1266   :  { %v3744_v17 = vpop.eup %3743 }
0x1267   :  { %2150 = vrot.lane.b32.xlu0 %v3744_v17, %s3772_s23  ;;  %v3636_v17 = vpack.c.bf16 %v2839_v16, %v2838_v13 }
0x126e   :  { %v3746_v18 = vpop.eup %3745 }
0x126f   :  { %2325 = vrot.lane.b32.xlu1 %v3746_v18, %s3772_s23 }
0x12d9   :  { %v2151_v19 = vpop.permute.xlu0 %2150 }
0x12da   :  { %v2153_v20 = vmul.f32 %v3740_v62, %v2151_v19 }
0x12dc   :  { %2332 = vrot.lane.b32.xlu0 %v2153_v20, %s3773_s24 }
0x12e0   :  { %2562 = vrot.lane.b32.xlu0 %v3740_v62, %s3773_s24 }
0x12e1   :  { %v2326_v21 = vpop.permute.xlu1 %2325 }
0x12e2   :  { %v2328_v22 = vmul.f32 %v3742_v2, %v2326_v21 }
0x12e4   :  { %2487 = vrot.lane.b32.xlu1 %v2328_v22, %s3773_s24  ;;  %v2982_v22 = vld [vmem:[%s4289_s8] ss:$0 sm:$0xff] }
0x134e   :  { %v2333_v25 = vpop.permute.xlu0 %2332 }
0x134f   :  { %3400 = vmatmul.mubr.msk.f32.vlgmr.msra.gmra.mrb[28].mxu1 %vm49_vm2, %v2333_v25 }
0x1350   :  { %3616 = vmatpush3.bf16.msra.mxu1 %v3927_v42  ;;  %3428 = vmatprep.mubr.msk.f32.mxu1 %vm3770_vm0, %v3771_v8 }
0x1351   :  { %3617 = vmatprep.subr.bf16.mxu1 %v3769_v0 }
0x1352   :  { %v2563_v26 = vpop.permute.xlu0 %2562 }
0x1354   :  { %3619 = vmatpush3.bf16.msra.mxu1 %v3938_v45 }
0x1355   :  { %3626 = vmatprep.subr.bf16.mxu1 %v3769_v0 }
0x1356   :  { %v2488_v27 = vpop.permute.xlu1 %2487 }
0x1357   :  { %3418 = vmatmul.mubr.msk.f32.vlgmr.msra.gmra.mrb[26].mxu0 %vm49_vm2, %v2488_v27  ;;  %3429 = vmatmul.mubr.msk.f32.vlgmr.msra.gmra.mrb[30].mxu1 %vm49_vm2, %v2563_v26 }
0x1358   :  { %3628 = vmatpush3.bf16.msra.mxu1 %v3927_v42  ;;  %3450 = vmatprep.mubr.msk.f32.mxu1 %vm3770_vm0, %v3771_v8 }
0x1359   :  { %3629 = vmatprep.subr.bf16.mxu1 %v3769_v0  ;;  %3622 = vmatpush3.bf16.msra.mxu0 %v3892_v32 }
0x135a   :  { %3623 = vmatprep.subr.bf16.mxu0 %v3769_v0  ;;  %3439 = vmatprep.mubr.msk.f32.mxu0 %vm3770_vm0, %v3771_v8 }
0x135c   :  { %3631 = vmatpush3.bf16.msra.mxu1 %v3938_v45 }
0x135d   :  { %3625 = vmatpush3.bf16.msra.mxu0 %v3902_v35 }
0x135e   :  { %3632 = vmatprep.subr.bf16.mxu0 %v3769_v0 }
0x1422   :  { %v2402_v28 = vpop.f32.mrb[28].mxu1 }
0x1423   :  { %v2476_v42 = vadd.f32 %v2475_v23, %v2402_v28  ;;  %v3401_v29 = vpop.f32.mrb[29].mxu1 }
0x1425   :  { %v2479_v44 = vadd.f32 %v3767_v43, %v2476_v42 }
0x142a   :  { %v2557_v30 = vpop.f32.mrb[26].mxu0  ;;  %v2632_v31 = vpop.f32.mrb[30].mxu1 }
0x142b   :  { %v2633_v33 = vadd.f32 %v2632_v31, %v2557_v30  ;;  %v3419_v34 = vpop.f32.mrb[27].mxu0  ;;  %v3430_v36 = vpop.f32.mrb[31].mxu1 }
0x142d   :  { %v2636_v32 = vadd.f32 %v3954_v55, %v2633_v33  ;;  %v2975_v55 = vmul.f32 -1.442695, %v2479_v44 }
0x142f   :  { %3747 = vtanh.f32 %v2636_v32  ;;  %v2978_v38 = vmul.f32 -1.442695, %v2636_v32 }
0x1431   :  { %3749 = vpow2.f32 %v2978_v38 }
0x1439   :  { %v3748_v37 = vpop.eup %3747 }
0x143a   :  { %2646 = vrot.lane.b32.xlu1 %v3748_v37, %s3772_s23 }
0x143b   :  { %v3750_v45 = vpop.eup %3749 }
0x143c   :  { %v2640_v35 = vadd.f32 1.0, %v3750_v45 }
0x143e   :  { %3751 = vrcp.f32 %v2640_v35 }
0x143f   :  { %3753 = vpow2.f32 %v2975_v55 }
0x1448   :  { %v3752_v39 = vpop.eup %3751 }
0x1449   :  { %v2644_v46 = vmul.f32 %v3752_v39, %v4202_v15  ;;  %v3754_v47 = vpop.eup %3753  ;;  %v3633_v15 = vpack.c.bf16 %v2837_v12, %v2836_v11 }
0x144a   :  { %v2483_v4 = vadd.f32 1.0, %v3754_v47 }
0x14ac   :  { %v2647_v40 = vpop.permute.xlu1 %2646 }
0x14ad   :  { %v2649_v41 = vmul.f32 %v3752_v39, %v2647_v40 }
0x14af   :  { %2651 = vrot.lane.b32.xlu0 %v2649_v41, %s3773_s24 }
0x1521   :  { %v2652_v48 = vpop.permute.xlu0 %2651 }
0x1522   :  { %v2654_v49 = vadd.f32 %v2652_v48, %v2644_v46 }
0x1524   :  { %3755 = vtanh.f32 %v2654_v49 }
0x1525   :  { %3757 = vrcp.f32 %v2483_v4 }
0x152e   :  { %v3756_v9 = vpop.eup %3755 }
0x152f   :  { %2657 = vrot.lane.b32.xlu1 %v3756_v9, %s3772_s23  ;;  %v3758_v50 = vpop.eup %3757 }
0x1533   :  { %2737 = vrot.lane.b32.xlu1 %v3758_v50, %s3773_s24 }
0x15a1   :  { %v2658_v51 = vpop.permute.xlu1 %2657 }
0x15a2   :  { %v2660_v52 = vmul.f32 %v3752_v39, %v2658_v51 }
0x15a4   :  { %2662 = vrot.lane.b32.xlu0 %v2660_v52, %s3773_s24 }
0x15a5   :  { %v2738_v53 = vpop.permute.xlu1 %2737 }
0x15a6   :  { %3451 = vmatmul.mubr.msk.f32.vlgmr.msra.gmra.mrb[32].mxu1 %vm49_vm2, %v2738_v53 }
0x1616   :  { %v2663_v54 = vpop.permute.xlu0 %2662 }
0x1617   :  { %3440 = vmatmul.mubr.msk.f32.vlgmr.msra.gmra.mrb[28].mxu0 %vm49_vm2, %v2663_v54 }
0x1618   :  { %3461 = vmatprep.mubr.msk.f32.mxu0 %vm3770_vm0, %v3771_v8  ;;  %3634 = vmatpush3.bf16.msra.mxu0 %v3633_v15 }
0x1619   :  { %3635 = vmatprep.subr.bf16.mxu0 %v3769_v0 }
0x161c   :  { %3637 = vmatpush3.bf16.msra.mxu0 %v3636_v17 }
0x1679   :  { %v2807_v56 = vpop.f32.mrb[32].mxu1 }
0x167a   :  { %v3452_v10 = vpop.f32.mrb[33].mxu1 }
0x16ea   :  { %v2732_v57 = vpop.f32.mrb[28].mxu0 }
0x16eb   :  { %v2808_v58 = vadd.f32 %v2807_v56, %v2732_v57  ;;  %v3441_v14 = vpop.f32.mrb[29].mxu0 }
0x16ed   :  { %v2811_v60 = vadd.f32 %v3768_v59, %v2808_v58 }
0x16ef   :  { %3759 = vtanh.f32 %v2811_v60  ;;  %v2981_v62 = vmul.f32 -1.442695, %v2811_v60 }
0x16f1   :  { %3761 = vpow2.f32 %v2981_v62 }
0x16f9   :  { %v3760_v61 = vpop.eup %3759 }
0x16fa   :  { %2821 = vrot.lane.b32.xlu0 %v3760_v61, %s3772_s23 }
0x16fb   :  { %v3762_v63 = vpop.eup %3761 }
0x16fc   :  { %v2815_v1 = vadd.f32 1.0, %v3762_v63 }
0x16fe   :  { %3763 = vrcp.f32 %v2815_v1 }
0x1708   :  { %v3764_v8 = vpop.eup %3763 }
0x1709   :  { %v2819_v5 = vmul.f32 %v3764_v8, %v2654_v49 }
0x176c   :  { %v2822_v2 = vpop.permute.xlu0 %2821 }
0x176d   :  { %v2824_v3 = vmul.f32 %v3764_v8, %v2822_v2 }
0x176f   :  { %2826 = vrot.lane.b32.xlu1 %v2824_v3, %s3773_s24 }
0x17e1   :  { %v2827_v6 = vpop.permute.xlu1 %2826 }
0x17e2   :  { %v2829_v7 = vadd.f32 %v2827_v6, %v2819_v5 }
0x17e4   :  { %3765 = vtanh.f32 %v2829_v7 }
0x17ee   :  { %v3766_v18 = vpop.eup %3765 }
0x17ef   :  { %2832 = vrot.lane.b32.xlu0 %v3766_v18, %s3772_s23 }
0x1861   :  { %v2833_v19 = vpop.permute.xlu0 %2832 }
0x1862   :  { %v2835_v20 = vmul.f32 %v3764_v8, %v2833_v19 }
0x1864   :  { %2848 = vrot.lane.b32.xlu1 %v2835_v20, %s3773_s24 }
0x18d6   :  { %v2849_v21 = vpop.permute.xlu1 %2848 }
0x18d7   :  { %3462 = vmatmul.mubr.msk.f32.vlgmr.msra.gmra.mrb[30].mxu0 %vm49_vm2, %v2849_v21 }
0x19aa   :  { %v2918_v23 = vpop.f32.mrb[30].mxu0 }
0x19ab   :  { %v2919_v24 = vadd.f32 %v2982_v22, %v2918_v23  ;;  %v3463_v25 = vpop.f32.mrb[31].mxu0 }
0x19ad   :  { %2922 = vst [vmem:[%s4290_s9] sm:$0x3] %v2919_v24 }

</bundles_post_ra>
